<compile_context>
chip_gen: v7x
topology: tpu7x:2x2x1
jax: 0.10.0
libtpu: 0.0.40
codegen_flags: <defaults>
</compile_context>

<pallas_src>
import functools
import math

import jax
import jax.numpy as jnp
from jax.experimental import pallas as pl
from jax.experimental.pallas import tpu as pltpu


# ----------------------------- fused Pallas kernel ---------------------------


def _gcn2net_fused_kernel(
    beta_ref,                                    # SMEM (L,) f32 (scalar prefetch)
    x_in_ref, w_init_ref, b_init_ref,            # init linear inputs
    a_ref,                                       # (tm, N_pad) bf16 row block of A
    w1_ref,                                      # (1, H_pad, H_pad) bf16 this layer
    w_fin_ref, b_fin_ref,                        # final linear inputs
    o_ref,                                       # (N_pad, O_pad) f32 output (resident)
    x_even, x_odd, x0_buf,                       # VMEM scratch (N_pad, H_pad) f32
    *, alpha, tm):
    l = pl.program_id(0)                 # layer index (outer, sequential)
    i = pl.program_id(1)                 # node-row block index (inner)
    last_l = pl.num_programs(0) - 1
    r0 = pl.multiple_of(i * tm, tm)      # row offset of this block

    # ---- init linear: x0 = x = x_in @ W_init^T + b  (once, fills all rows) ----
    @pl.when((l == 0) & (i == 0))
    def _():
        h0 = jnp.dot(x_in_ref[...], w_init_ref[...],
                     preferred_element_type=jnp.float32) + b_init_ref[...]
        x0_buf[...] = h0
        x_even[...] = h0

    beta = beta_ref[l]                   # per-layer beta from SMEM (no re-compile)
    w1 = w1_ref[0]                       # (H_pad, H_pad) bf16

    def gcn2_layer_block(src_buf, dst_buf):
        # h = A[rows] @ x   (bf16 operands, f32 accumulation on the MXU)
        h = jnp.dot(a_ref[...], src_buf[...].astype(jnp.bfloat16),
                    preferred_element_type=jnp.float32)
        h = (1.0 - alpha) * h + alpha * x0_buf[pl.ds(r0, tm), :]
        hw = jnp.dot(h.astype(jnp.bfloat16), w1,
                     preferred_element_type=jnp.float32)
        x_new = jnp.maximum((1.0 - beta) * h + beta * hw, 0.0)
        dst_buf[pl.ds(r0, tm), :] = x_new
        # TODO(synk): training-mode dropout (p=drop_prob) omitted — eval-mode identity.

        # ---- final linear fused into the last layer's visit of this row block ----
        @pl.when(l == last_l)
        def _():
            o_ref[pl.ds(r0, tm), :] = (
                jnp.dot(x_new, w_fin_ref[...], preferred_element_type=jnp.float32)
                + b_fin_ref[...])

    # Ping-pong the layer state so every row block of layer l reads the complete
    # layer (l-1) state (static refs, branch chosen by layer parity).
    @pl.when(l % 2 == 0)
    def _():
        gcn2_layer_block(x_even, x_odd)

    @pl.when(l % 2 == 1)
    def _():
        gcn2_layer_block(x_odd, x_even)


# ------------------------------ host-side wrapper ----------------------------


def _round_up(x, m):
    return (x + m - 1) // m * m


def gcn2net_forward(params, x, a_norm, *, alpha=0.1, theta=0.5, tm=128):
    n, f_in = x.shape
    hidden = params["init_b"].shape[0]
    out_f = params["final_b"].shape[0]
    num_layers = params["conv_w"].shape[0]

    n_pad = _round_up(n, tm)
    f_pad = _round_up(f_in, 128)
    h_pad = _round_up(hidden, 128)
    o_pad = _round_up(out_f, 128)

    # Zero-pad to lane-dense shapes, pre-transpose linear weights, cast the big
    # matmul operands (A, W1) to bf16. Zero padding keeps the valid rows/cols exact.
    x_p = jnp.zeros((n_pad, f_pad), jnp.float32).at[:n, :f_in].set(x)
    a_p = (jnp.zeros((n_pad, n_pad), jnp.float32).at[:n, :n].set(a_norm)
           .astype(jnp.bfloat16))
    w_init_t = (jnp.zeros((f_pad, h_pad), jnp.float32)
                .at[:f_in, :hidden].set(params["init_w"].T))
    b_init = jnp.zeros((1, h_pad), jnp.float32).at[0, :hidden].set(params["init_b"])
    w1 = (jnp.zeros((num_layers, h_pad, h_pad), jnp.float32)
          .at[:, :hidden, :hidden].set(params["conv_w"]).astype(jnp.bfloat16))
    w_fin_t = (jnp.zeros((h_pad, o_pad), jnp.float32)
               .at[:hidden, :out_f].set(params["final_w"].T))
    b_fin = jnp.zeros((1, o_pad), jnp.float32).at[0, :out_f].set(params["final_b"])

    betas = jnp.log(theta / jnp.arange(1, num_layers + 1, dtype=jnp.float32) + 1.0)

    r = n_pad // tm
    grid = (num_layers, r)   # layer axis outer, row-block axis inner (both sequential)

    kern = functools.partial(_gcn2net_fused_kernel, alpha=float(alpha), tm=tm)

    flops = (2 * n_pad * f_pad * h_pad
             + num_layers * (2 * n_pad * n_pad * h_pad + 2 * n_pad * h_pad * h_pad)
             + 2 * n_pad * h_pad * o_pad)
    bytes_accessed = (x_p.size * 4
                      + a_p.size * 2 * (1 if r == 1 else num_layers)
                      + w1.size * 2 + w_init_t.size * 4 + w_fin_t.size * 4
                      + n_pad * o_pad * 4)

    out_pad = pl.pallas_call(
        kern,
        grid_spec=pltpu.PrefetchScalarGridSpec(
            num_scalar_prefetch=1,                      # betas -> SMEM
            grid=grid,
            in_specs=[
                pl.BlockSpec((n_pad, f_pad), lambda l, i, b: (0, 0)),      # x_in
                pl.BlockSpec((f_pad, h_pad), lambda l, i, b: (0, 0)),      # W_init^T
                pl.BlockSpec((1, h_pad), lambda l, i, b: (0, 0)),          # b_init
                pl.BlockSpec((tm, n_pad), lambda l, i, b: (i, 0)),         # A row block
                pl.BlockSpec((1, h_pad, h_pad), lambda l, i, b: (l, 0, 0)),# W1[layer]
                pl.BlockSpec((h_pad, o_pad), lambda l, i, b: (0, 0)),      # W_final^T
                pl.BlockSpec((1, o_pad), lambda l, i, b: (0, 0)),          # b_final
            ],
            out_specs=pl.BlockSpec((n_pad, o_pad), lambda l, i, b: (0, 0)),
            scratch_shapes=[
                pltpu.VMEM((n_pad, h_pad), jnp.float32),   # x state (even layers read)
                pltpu.VMEM((n_pad, h_pad), jnp.float32),   # x state (odd layers read)
                pltpu.VMEM((n_pad, h_pad), jnp.float32),   # x0 residual
            ],
        ),
        out_shape=jax.ShapeDtypeStruct((n_pad, o_pad), jnp.float32),
        compiler_params=pltpu.CompilerParams(
            # Layer axis is sequential; row blocks of one layer write a shared
            # scratch buffer, so keep both axes "arbitrary".
            dimension_semantics=("arbitrary", "arbitrary"),
        ),
        cost_estimate=pl.CostEstimate(flops=flops, transcendentals=0,
                                      bytes_accessed=bytes_accessed),
    )(betas, x_p, w_init_t, b_init, a_p, w1, w_fin_t, b_fin)

    return out_pad[:n, :out_f]


# ------------------------------ JAX glue / reference --------------------------


def dense_gcn_norm(edge_index, num_nodes):
    """Dense equivalent of PyG gcn_norm with add_self_loops=True (improved=False)."""
    row, col = edge_index
    a = jnp.zeros((num_nodes, num_nodes), jnp.float32).at[row, col].add(1.0)
    a = a + jnp.eye(num_nodes, dtype=jnp.float32)
    deg = a.sum(axis=1)
    dinv = jnp.where(deg > 0, 1.0 / jnp.sqrt(deg), 0.0)
    return dinv[:, None] * a * dinv[None, :]


def init_params(key, input_size, output_size, hidden_size, num_layers):
    ks = jax.random.split(key, 5)
    si = 1.0 / math.sqrt(input_size)
    sh = 1.0 / math.sqrt(hidden_size)
    g = math.sqrt(6.0 / (2 * hidden_size))
    return {
        "init_w": jax.random.uniform(ks[0], (hidden_size, input_size), jnp.float32, -si, si),
        "init_b": jax.random.uniform(ks[1], (hidden_size,), jnp.float32, -si, si),
        "final_w": jax.random.uniform(ks[2], (output_size, hidden_size), jnp.float32, -sh, sh),
        "final_b": jax.random.uniform(ks[3], (output_size,), jnp.float32, -sh, sh),
        "conv_w": jax.random.uniform(ks[4], (num_layers, hidden_size, hidden_size),
                                     jnp.float32, -g, g),
    }


def reference_forward(params, x, a_norm, alpha, theta):
    """Pure-JAX f32 reference matching the PyTorch module semantics (eval mode)."""
    h = x @ params["init_w"].T + params["init_b"]
    x0 = h
    for li in range(params["conv_w"].shape[0]):
        beta = math.log(theta / (li + 1) + 1.0)
        hh = a_norm @ h
        hh = (1.0 - alpha) * hh + alpha * x0
        out = (1.0 - beta) * hh + beta * (hh @ params["conv_w"][li])
        h = jnp.maximum(out, 0.0)
    return h @ params["final_w"].T + params["final_b"]


# ------------------------------------ main ------------------------------------

if __name__ == "__main__":
    N = 200           # num graph nodes (padded to 256 -> 2 row blocks of 128)
    INPUT = 12        # input_size
    HIDDEN = 64       # hidden_size (padded to 128 lanes)
    OUTPUT = 7        # output_size (padded to 128 lanes)
    NUM_LAYERS = 4
    ALPHA, THETA = 0.1, 0.5

    key = jax.random.PRNGKey(0)
    k_x, k_p = jax.random.split(key)

    x = jax.random.normal(k_x, (N, INPUT), jnp.float32)

    # Undirected ring + chord graph -> edge_index of shape (2, 4N)
    src = jnp.arange(N, dtype=jnp.int32)
    ring = (src + 1) % N
    chord = (src + 7) % N
    edge_index = jnp.stack(
        [jnp.concatenate([src, ring, src, chord]),
         jnp.concatenate([ring, src, chord, src])], axis=0)

    a_norm = dense_gcn_norm(edge_index, N)
    params = init_params(k_p, INPUT, OUTPUT, HIDDEN, NUM_LAYERS)

    out = gcn2net_forward(params, x, a_norm, alpha=ALPHA, theta=THETA)
    out = jax.block_until_ready(out)
    assert out.shape == (N, OUTPUT) and out.dtype == jnp.float32

    # Numerical check vs. f32 reference (bf16 A/W1 on the MXU => small drift).
    ref = reference_forward(params, x, a_norm, ALPHA, THETA)
    err = float(jnp.max(jnp.abs(out - ref)) / jnp.maximum(jnp.max(jnp.abs(ref)), 1.0))
    assert err < 5e-2, f"mismatch vs reference: {err}"

    print("KERNEL_OK")
</pallas_src>

<mosaic_0001>
module attributes {stable_mosaic.version = 11 : i64} {
  func.func @_gcn2net_fused_kernel(%arg0: i32, %arg1: i32, %arg2: memref<4xf32, #tpu.memory_space<smem>>, %arg3: memref<256x128xf32, #tpu.memory_space<vmem>>, %arg4: memref<128x128xf32, #tpu.memory_space<vmem>>, %arg5: memref<1x128xf32, #tpu.memory_space<vmem>>, %arg6: memref<128x256xbf16, #tpu.memory_space<vmem>>, %arg7: memref<1x128x128xbf16, #tpu.memory_space<vmem>>, %arg8: memref<128x128xf32, #tpu.memory_space<vmem>>, %arg9: memref<1x128xf32, #tpu.memory_space<vmem>>, %arg10: memref<256x128xf32, #tpu.memory_space<vmem>>, %arg11: memref<256x128xf32, #tpu.memory_space<vmem>>, %arg12: memref<256x128xf32, #tpu.memory_space<vmem>>, %arg13: memref<256x128xf32, #tpu.memory_space<vmem>>) attributes {dimension_semantics = [#tpu.dimension_semantics<arbitrary>, #tpu.dimension_semantics<arbitrary>], iteration_bounds = array<i64: 4, 2>, scalar_prefetch = 1 : i64, scratch_operands = 3 : i64, tpu.core_type = #tpu.core_type<tc>, window_params = [{pipeline_mode = #tpu.pipeline_mode<synchronous>, transform_indices = @transform_0, window_bounds = array<i64: 256, 128>}, {pipeline_mode = #tpu.pipeline_mode<synchronous>, transform_indices = @transform_1, window_bounds = array<i64: 128, 128>}, {pipeline_mode = #tpu.pipeline_mode<synchronous>, transform_indices = @transform_2, window_bounds = array<i64: 1, 128>}, {transform_indices = @transform_3, window_bounds = array<i64: 128, 256>}, {transform_indices = @transform_4, window_bounds = array<i64: 1, 128, 128>}, {pipeline_mode = #tpu.pipeline_mode<synchronous>, transform_indices = @transform_5, window_bounds = array<i64: 128, 128>}, {pipeline_mode = #tpu.pipeline_mode<synchronous>, transform_indices = @transform_6, window_bounds = array<i64: 1, 128>}, {pipeline_mode = #tpu.pipeline_mode<synchronous>, transform_indices = @transform_7, window_bounds = array<i64: 256, 128>}]} {
    %c128_i32 = arith.constant 128 : i32
    %0 = arith.muli %arg1, %c128_i32 : i32
    %1 = tpu.assume_multiple %0, 128 : i32
    %c0_i32 = arith.constant 0 : i32
    %2 = arith.cmpi eq, %arg0, %c0_i32 : i32
    %c0_i32_0 = arith.constant 0 : i32
    %3 = arith.cmpi eq, %arg1, %c0_i32_0 : i32
    %4 = arith.andi %2, %3 : i1
    %5 = arith.extui %4 : i1 to i32
    %c0_i32_1 = arith.constant 0 : i32
    %6 = arith.cmpi ne, %5, %c0_i32_1 : i32
    scf.if %6 {
      %c0_18 = arith.constant 0 : index
      %c0_19 = arith.constant 0 : index
      %37 = vector.load %arg3[%c0_18, %c0_19] : memref<256x128xf32, #tpu.memory_space<vmem>>, vector<256x128xf32>
      %c0_20 = arith.constant 0 : index
      %c0_21 = arith.constant 0 : index
      %38 = vector.load %arg4[%c0_20, %c0_21] : memref<128x128xf32, #tpu.memory_space<vmem>>, vector<128x128xf32>
      %cst = arith.constant dense<0.000000e+00> : vector<256x128xf32>
      %39 = tpu.matmul %37, %38, %cst {dimension_numbers = #tpu.dot_dimension_numbers<[1], [0], [0], [1], [0, 0, 1, 1], [], []>} : vector<256x128xf32>, vector<128x128xf32>, vector<256x128xf32> -> vector<256x128xf32>
      %c0_22 = arith.constant 0 : index
      %c0_23 = arith.constant 0 : index
      %40 = vector.load %arg5[%c0_22, %c0_23] : memref<1x128xf32, #tpu.memory_space<vmem>>, vector<1x128xf32>
      %41 = vector.broadcast %40 : vector<1x128xf32> to vector<256x128xf32>
      %42 = arith.addf %39, %41 : vector<256x128xf32>
      %c0_24 = arith.constant 0 : index
      %c0_25 = arith.constant 0 : index
      %43 = vector.load %arg13[%c0_24, %c0_25] : memref<256x128xf32, #tpu.memory_space<vmem>>, vector<256x128xf32>
      tpu.vector_store %arg13[%c0_24, %c0_25], %42 {strides = array<i32>} : memref<256x128xf32, #tpu.memory_space<vmem>>, vector<256x128xf32>,
      %c0_26 = arith.constant 0 : index
      %c0_27 = arith.constant 0 : index
      %44 = vector.load %arg11[%c0_26, %c0_27] : memref<256x128xf32, #tpu.memory_space<vmem>>, vector<256x128xf32>
      tpu.vector_store %arg11[%c0_26, %c0_27], %42 {strides = array<i32>} : memref<256x128xf32, #tpu.memory_space<vmem>>, vector<256x128xf32>,
    } else {
    }
    %7 = arith.index_cast %arg0 : i32 to index
    %8 = memref.load %arg2[%7] : memref<4xf32, #tpu.memory_space<smem>>
    %c0 = arith.constant 0 : index
    %c0_2 = arith.constant 0 : index
    %c0_3 = arith.constant 0 : index
    %9 = vector.load %arg7[%c0, %c0_2, %c0_3] : memref<1x128x128xbf16, #tpu.memory_space<vmem>>, vector<1x128x128xbf16>
    %10 = vector.shape_cast %9 : vector<1x128x128xbf16> to vector<128x128xbf16>
    %c2_i32 = arith.constant 2 : i32
    %c0_i32_4 = arith.constant 0 : i32
    %11 = arith.cmpi eq, %c2_i32, %c0_i32_4 : i32
    %c1_i32 = arith.constant 1 : i32
    %12 = arith.select %11, %c1_i32, %c2_i32 : i32
    %13 = arith.remsi %arg0, %12 : i32
    %c0_i32_5 = arith.constant 0 : i32
    %14 = arith.cmpi ne, %13, %c0_i32_5 : i32
    %c0_i32_6 = arith.constant 0 : i32
    %15 = arith.cmpi slt, %13, %c0_i32_6 : i32
    %c0_i32_7 = arith.constant 0 : i32
    %16 = arith.cmpi slt, %12, %c0_i32_7 : i32
    %17 = arith.xori %15, %16 : i1
    %18 = arith.andi %17, %14 : i1
    %19 = arith.addi %13, %12 : i32
    %20 = arith.select %18, %19, %13 : i32
    %c0_i32_8 = arith.constant 0 : i32
    %21 = arith.cmpi eq, %20, %c0_i32_8 : i32
    %22 = arith.extui %21 : i1 to i32
    %c0_i32_9 = arith.constant 0 : i32
    %23 = arith.cmpi ne, %22, %c0_i32_9 : i32
    scf.if %23 {
      %c0_18 = arith.constant 0 : index
      %c0_19 = arith.constant 0 : index
      %37 = vector.load %arg6[%c0_18, %c0_19] : memref<128x256xbf16, #tpu.memory_space<vmem>>, vector<128x256xbf16>
      %c0_20 = arith.constant 0 : index
      %c0_21 = arith.constant 0 : index
      %38 = vector.load %arg11[%c0_20, %c0_21] : memref<256x128xf32, #tpu.memory_space<vmem>>, vector<256x128xf32>
      %39 = arith.truncf %38 : vector<256x128xf32> to vector<256x128xbf16>
      %cst = arith.constant dense<0.000000e+00> : vector<128x128xf32>
      %40 = tpu.matmul %37, %39, %cst {dimension_numbers = #tpu.dot_dimension_numbers<[1], [0], [0], [1], [0, 0, 1, 1], [], []>} : vector<128x256xbf16>, vector<256x128xbf16>, vector<128x128xf32> -> vector<128x128xf32>
      %cst_22 = arith.constant 0.899999976 : f32
      %41 = vector.broadcast %cst_22 : f32 to vector<128x128xf32>
      %42 = arith.mulf %41, %40 : vector<128x128xf32>
      %43 = arith.index_cast %1 : i32 to index
      %c0_23 = arith.constant 0 : index
      %44 = vector.load %arg13[%43, %c0_23] : memref<256x128xf32, #tpu.memory_space<vmem>>, vector<128x128xf32>
      %cst_24 = arith.constant 1.000000e-01 : f32
      %45 = vector.broadcast %cst_24 : f32 to vector<128x128xf32>
      %46 = arith.mulf %45, %44 : vector<128x128xf32>
      %47 = arith.addf %42, %46 : vector<128x128xf32>
      %48 = arith.truncf %47 : vector<128x128xf32> to vector<128x128xbf16>
      %cst_25 = arith.constant dense<0.000000e+00> : vector<128x128xf32>
      %49 = tpu.matmul %48, %10, %cst_25 {dimension_numbers = #tpu.dot_dimension_numbers<[1], [0], [0], [1], [0, 0, 1, 1], [], []>} : vector<128x128xbf16>, vector<128x128xbf16>, vector<128x128xf32> -> vector<128x128xf32>
      %cst_26 = arith.constant 1.000000e+00 : f32
      %50 = arith.subf %cst_26, %8 : f32
      %51 = vector.broadcast %50 : f32 to vector<128x128xf32>
      %52 = arith.mulf %51, %47 : vector<128x128xf32>
      %53 = vector.broadcast %8 : f32 to vector<128x128xf32>
      %54 = arith.mulf %53, %49 : vector<128x128xf32>
      %55 = arith.addf %52, %54 : vector<128x128xf32>
      %cst_27 = arith.constant 0.000000e+00 : f32
      %56 = vector.broadcast %cst_27 : f32 to vector<128x128xf32>
      %57 = arith.maximumf %55, %56 : vector<128x128xf32>
      %58 = arith.index_cast %1 : i32 to index
      %c0_28 = arith.constant 0 : index
      %59 = vector.load %arg12[%58, %c0_28] : memref<256x128xf32, #tpu.memory_space<vmem>>, vector<128x128xf32>
      tpu.vector_store %arg12[%58, %c0_28], %57 {strides = array<i32>} : memref<256x128xf32, #tpu.memory_space<vmem>>, vector<128x128xf32>,
      %c3_i32 = arith.constant 3 : i32
      %60 = arith.cmpi eq, %arg0, %c3_i32 : i32
      %61 = arith.extui %60 : i1 to i32
      %c0_i32_29 = arith.constant 0 : i32
      %62 = arith.cmpi ne, %61, %c0_i32_29 : i32
      scf.if %62 {
        %c0_30 = arith.constant 0 : index
        %c0_31 = arith.constant 0 : index
        %63 = vector.load %arg8[%c0_30, %c0_31] : memref<128x128xf32, #tpu.memory_space<vmem>>, vector<128x128xf32>
        %cst_32 = arith.constant dense<0.000000e+00> : vector<128x128xf32>
        %64 = tpu.matmul %57, %63, %cst_32 {dimension_numbers = #tpu.dot_dimension_numbers<[1], [0], [0], [1], [0, 0, 1, 1], [], []>} : vector<128x128xf32>, vector<128x128xf32>, vector<128x128xf32> -> vector<128x128xf32>
        %c0_33 = arith.constant 0 : index
        %c0_34 = arith.constant 0 : index
        %65 = vector.load %arg9[%c0_33, %c0_34] : memref<1x128xf32, #tpu.memory_space<vmem>>, vector<1x128xf32>
        %66 = vector.broadcast %65 : vector<1x128xf32> to vector<128x128xf32>
        %67 = arith.addf %64, %66 : vector<128x128xf32>
        %68 = arith.index_cast %1 : i32 to index
        %c0_35 = arith.constant 0 : index
        %69 = vector.load %arg10[%68, %c0_35] : memref<256x128xf32, #tpu.memory_space<vmem>>, vector<128x128xf32>
        tpu.vector_store %arg10[%68, %c0_35], %67 {strides = array<i32>} : memref<256x128xf32, #tpu.memory_space<vmem>>, vector<128x128xf32>,
      } else {
      }
    } else {
    }
    %c2_i32_10 = arith.constant 2 : i32
    %c0_i32_11 = arith.constant 0 : i32
    %24 = arith.cmpi eq, %c2_i32_10, %c0_i32_11 : i32
    %c1_i32_12 = arith.constant 1 : i32
    %25 = arith.select %24, %c1_i32_12, %c2_i32_10 : i32
    %26 = arith.remsi %arg0, %25 : i32
    %c0_i32_13 = arith.constant 0 : i32
    %27 = arith.cmpi ne, %26, %c0_i32_13 : i32
    %c0_i32_14 = arith.constant 0 : i32
    %28 = arith.cmpi slt, %26, %c0_i32_14 : i32
    %c0_i32_15 = arith.constant 0 : i32
    %29 = arith.cmpi slt, %25, %c0_i32_15 : i32
    %30 = arith.xori %28, %29 : i1
    %31 = arith.andi %30, %27 : i1
    %32 = arith.addi %26, %25 : i32
    %33 = arith.select %31, %32, %26 : i32
    %c1_i32_16 = arith.constant 1 : i32
    %34 = arith.cmpi eq, %33, %c1_i32_16 : i32
    %35 = arith.extui %34 : i1 to i32
    %c0_i32_17 = arith.constant 0 : i32
    %36 = arith.cmpi ne, %35, %c0_i32_17 : i32
    scf.if %36 {
      %c0_18 = arith.constant 0 : index
      %c0_19 = arith.constant 0 : index
      %37 = vector.load %arg6[%c0_18, %c0_19] : memref<128x256xbf16, #tpu.memory_space<vmem>>, vector<128x256xbf16>
      %c0_20 = arith.constant 0 : index
      %c0_21 = arith.constant 0 : index
      %38 = vector.load %arg12[%c0_20, %c0_21] : memref<256x128xf32, #tpu.memory_space<vmem>>, vector<256x128xf32>
      %39 = arith.truncf %38 : vector<256x128xf32> to vector<256x128xbf16>
      %cst = arith.constant dense<0.000000e+00> : vector<128x128xf32>
      %40 = tpu.matmul %37, %39, %cst {dimension_numbers = #tpu.dot_dimension_numbers<[1], [0], [0], [1], [0, 0, 1, 1], [], []>} : vector<128x256xbf16>, vector<256x128xbf16>, vector<128x128xf32> -> vector<128x128xf32>
      %cst_22 = arith.constant 0.899999976 : f32
      %41 = vector.broadcast %cst_22 : f32 to vector<128x128xf32>
      %42 = arith.mulf %41, %40 : vector<128x128xf32>
      %43 = arith.index_cast %1 : i32 to index
      %c0_23 = arith.constant 0 : index
      %44 = vector.load %arg13[%43, %c0_23] : memref<256x128xf32, #tpu.memory_space<vmem>>, vector<128x128xf32>
      %cst_24 = arith.constant 1.000000e-01 : f32
      %45 = vector.broadcast %cst_24 : f32 to vector<128x128xf32>
      %46 = arith.mulf %45, %44 : vector<128x128xf32>
      %47 = arith.addf %42, %46 : vector<128x128xf32>
      %48 = arith.truncf %47 : vector<128x128xf32> to vector<128x128xbf16>
      %cst_25 = arith.constant dense<0.000000e+00> : vector<128x128xf32>
      %49 = tpu.matmul %48, %10, %cst_25 {dimension_numbers = #tpu.dot_dimension_numbers<[1], [0], [0], [1], [0, 0, 1, 1], [], []>} : vector<128x128xbf16>, vector<128x128xbf16>, vector<128x128xf32> -> vector<128x128xf32>
      %cst_26 = arith.constant 1.000000e+00 : f32
      %50 = arith.subf %cst_26, %8 : f32
      %51 = vector.broadcast %50 : f32 to vector<128x128xf32>
      %52 = arith.mulf %51, %47 : vector<128x128xf32>
      %53 = vector.broadcast %8 : f32 to vector<128x128xf32>
      %54 = arith.mulf %53, %49 : vector<128x128xf32>
      %55 = arith.addf %52, %54 : vector<128x128xf32>
      %cst_27 = arith.constant 0.000000e+00 : f32
      %56 = vector.broadcast %cst_27 : f32 to vector<128x128xf32>
      %57 = arith.maximumf %55, %56 : vector<128x128xf32>
      %58 = arith.index_cast %1 : i32 to index
      %c0_28 = arith.constant 0 : index
      %59 = vector.load %arg11[%58, %c0_28] : memref<256x128xf32, #tpu.memory_space<vmem>>, vector<128x128xf32>
      tpu.vector_store %arg11[%58, %c0_28], %57 {strides = array<i32>} : memref<256x128xf32, #tpu.memory_space<vmem>>, vector<128x128xf32>,
      %c3_i32 = arith.constant 3 : i32
      %60 = arith.cmpi eq, %arg0, %c3_i32 : i32
      %61 = arith.extui %60 : i1 to i32
      %c0_i32_29 = arith.constant 0 : i32
      %62 = arith.cmpi ne, %61, %c0_i32_29 : i32
      scf.if %62 {
        %c0_30 = arith.constant 0 : index
        %c0_31 = arith.constant 0 : index
        %63 = vector.load %arg8[%c0_30, %c0_31] : memref<128x128xf32, #tpu.memory_space<vmem>>, vector<128x128xf32>
        %cst_32 = arith.constant dense<0.000000e+00> : vector<128x128xf32>
        %64 = tpu.matmul %57, %63, %cst_32 {dimension_numbers = #tpu.dot_dimension_numbers<[1], [0], [0], [1], [0, 0, 1, 1], [], []>} : vector<128x128xf32>, vector<128x128xf32>, vector<128x128xf32> -> vector<128x128xf32>
        %c0_33 = arith.constant 0 : index
        %c0_34 = arith.constant 0 : index
        %65 = vector.load %arg9[%c0_33, %c0_34] : memref<1x128xf32, #tpu.memory_space<vmem>>, vector<1x128xf32>
        %66 = vector.broadcast %65 : vector<1x128xf32> to vector<128x128xf32>
        %67 = arith.addf %64, %66 : vector<128x128xf32>
        %68 = arith.index_cast %1 : i32 to index
        %c0_35 = arith.constant 0 : index
        %69 = vector.load %arg10[%68, %c0_35] : memref<256x128xf32, #tpu.memory_space<vmem>>, vector<128x128xf32>
        tpu.vector_store %arg10[%68, %c0_35], %67 {strides = array<i32>} : memref<256x128xf32, #tpu.memory_space<vmem>>, vector<128x128xf32>,
      } else {
      }
    } else {
    }
    return
  }
  func.func @transform_0(%arg0: i32, %arg1: i32, %arg2: memref<4xf32, #tpu.memory_space<smem>>) -> (i32, i32) {
    %c0_i32 = arith.constant 0 : i32
    %c0_i32_0 = arith.constant 0 : i32
    %c0_i32_1 = arith.constant 0 : i32
    return %c0_i32, %c0_i32_0 : i32, i32
  }
  func.func @transform_1(%arg0: i32, %arg1: i32, %arg2: memref<4xf32, #tpu.memory_space<smem>>) -> (i32, i32) {
    %c0_i32 = arith.constant 0 : i32
    %c0_i32_0 = arith.constant 0 : i32
    %c0_i32_1 = arith.constant 0 : i32
    return %c0_i32, %c0_i32_0 : i32, i32
  }
  func.func @transform_2(%arg0: i32, %arg1: i32, %arg2: memref<4xf32, #tpu.memory_space<smem>>) -> (i32, i32) {
    %c0_i32 = arith.constant 0 : i32
    %c0_i32_0 = arith.constant 0 : i32
    %c0_i32_1 = arith.constant 0 : i32
    return %c0_i32, %c0_i32_0 : i32, i32
  }
  func.func @transform_3(%arg0: i32, %arg1: i32, %arg2: memref<4xf32, #tpu.memory_space<smem>>) -> (i32, i32) {
    %c0_i32 = arith.constant 0 : i32
    %c0_i32_0 = arith.constant 0 : i32
    return %arg1, %c0_i32 : i32, i32
  }
  func.func @transform_4(%arg0: i32, %arg1: i32, %arg2: memref<4xf32, #tpu.memory_space<smem>>) -> (i32, i32, i32) {
    %c0_i32 = arith.constant 0 : i32
    %c0_i32_0 = arith.constant 0 : i32
    %c0_i32_1 = arith.constant 0 : i32
    return %arg0, %c0_i32, %c0_i32_0 : i32, i32, i32
  }
  func.func @transform_5(%arg0: i32, %arg1: i32, %arg2: memref<4xf32, #tpu.memory_space<smem>>) -> (i32, i32) {
    %c0_i32 = arith.constant 0 : i32
    %c0_i32_0 = arith.constant 0 : i32
    %c0_i32_1 = arith.constant 0 : i32
    return %c0_i32, %c0_i32_0 : i32, i32
  }
  func.func @transform_6(%arg0: i32, %arg1: i32, %arg2: memref<4xf32, #tpu.memory_space<smem>>) -> (i32, i32) {
    %c0_i32 = arith.constant 0 : i32
    %c0_i32_0 = arith.constant 0 : i32
    %c0_i32_1 = arith.constant 0 : i32
    return %c0_i32, %c0_i32_0 : i32, i32
  }
  func.func @transform_7(%arg0: i32, %arg1: i32, %arg2: memref<4xf32, #tpu.memory_space<smem>>) -> (i32, i32) {
    %c0_i32 = arith.constant 0 : i32
    %c0_i32_0 = arith.constant 0 : i32
    %c0_i32_1 = arith.constant 0 : i32
    return %c0_i32, %c0_i32_0 : i32, i32
  }
}

</mosaic_0001>

<bundles_post_ra>
// kernel: tpu_custom_call.1
= control target key start
LH: loop header
LB: loop body
LE: loop exit
PB: predicated region body
PF: predicated region fallthrough
CT: control target
= control target key end

     0   :  { %s4745_s0 = inlined_call_operand.hbm [shape: f32[4], index: 0, kind: input, shape index: {}]   ;;  %s4746_s1 = inlined_call_operand.hbm [shape: f32[256,128], index: 1, kind: input, shape index: {}]   ;;  %s4747_s2 = inlined_call_operand.hbm [shape: f32[128,128], index: 2, kind: input, shape index: {}]   ;;  %s4748_s3 = inlined_call_operand.vmem [shape: f32[1,128], index: 3, kind: input, shape index: {}]   ;;  %s4749_s4 = inlined_call_operand.hbm [shape: bf16[256,256], index: 4, kind: input, shape index: {}]   ;;  %s4750_s5 = inlined_call_operand.hbm [shape: bf16[4,128,128], index: 5, kind: input, shape index: {}]   ;;  %s4751_s6 = inlined_call_operand.hbm [shape: f32[128,128], index: 6, kind: input, shape index: {}]   ;;  %s4752_s7 = inlined_call_operand.vmem [shape: f32[1,128], index: 7, kind: input, shape index: {}]   ;;  %s4753_s8 = inlined_call_operand.hbm [shape: f32[256,128], index: 8, kind: output, shape index: {}]  }
   0x1   :  { %4770 = sst [smem:[#allocation26_spill]] %s4746_s1  ;;  %s3316_s29 = scalar_lea.hbm %s4745_s0, 16 }
   0x2   :  { %4771 = sst [smem:[#allocation27_spill]] %s4747_s2  ;;  %p3317_p0 = scmp.ne.s32.totalorder %s4745_s0, %s3316_s29 }
   0x3   :  { %4772 = sst [smem:[#allocation28_spill]] %s4748_s3  ;;  %p3320_p1 = scmp.lt.u32.totalorder %s3316_s29, %s4745_s0 }
   0x4   :  { %4773 = sst [smem:[#allocation29_spill]] %s4749_s4 }
   0x5   :  { %4774 = sst [smem:[#allocation30_spill]] %s4752_s7  ;;  %p3322_p2 = pnand %p3320_p1, %p3317_p0 }
   0x6   :  { %4775 = sst [smem:[#allocation31_spill]] %s4753_s8 }
   0x7   :  { %3325 = shalt.err (!%p3322_p2)  }
   0x8   :  { %s3610_s12 = smov [#allocation6]  }
   0x9   :  { %14 = dma.hbm_to_smem %s4745_s0, 16, %s3610_s12, [#allocation5] }
   0xa   :  { %3540 = dma.done.wait [#allocation5], 16 }
   0xb   :  { %3541 = vsyncadd [#allocation5], 4294967280 }
   0xc   :  { %16 = sfence }
   0xd   :  { %17 = vsyncpa [#allocation8], 0 }
   0xe   :  { %18 = vsyncpa [#allocation11], 0 }
   0xf   :  { %19 = vsyncpa [#allocation9], 0  ;;  %s3680_s15 = smov 0   ;;  %s3682_s16 = smov 0  }
  0x10   :  { %s3684_s17 = smov 0   ;;  %s3686_s18 = smov 0  }
  0x11   :  { %s3688_s19 = smov 0   ;;  %s3690_s20 = smov 0  }
  0x12   :  { %s3692_s21 = smov 0   ;;  %s3694_s0 = smov 0  }
  0x13   :  { %s3696_s22 = smov 0   ;;  %s3698_s23 = smov 0  }
  0x14   :  { %s3700_s24 = smov 0  }
  0x15 LB: > { %4776 = sst [smem:[#allocation23_spill]] %s3592_s21  ;;  %s3732_s25 = sadd.s32 4294967295, %s3608_s24   ;;  %s3608_s24 = sphi %s3700_s24, %s25_s24   ;;  %s3604_s23 = sphi %s3698_s23, %s4824_s23   ;;  %s3600_s22 = sphi %s3696_s22, %s4823_s22   ;;  %s3596_s0 = sphi %s3694_s0, %s4822_s0   ;;  %s3592_s21 = sphi %s3692_s21, %s4821_s21   ;;  %s3588_s20 = sphi %s3690_s20, %s4820_s20   ;;  %s3584_s19 = sphi %s3688_s19, %s4819_s19   ;;  %s3580_s18 = sphi %s3686_s18, %s4818_s18   ;;  %s3576_s17 = sphi %s3684_s17, %s4817_s17   ;;  %s3572_s16 = sphi %s3682_s16, %s4816_s16   ;;  %s3568_s15 = sphi %s3680_s15, %s4815_s15  }
  0x16   : > { %4777 = sst [smem:[#allocation24_spill]] %s3596_s0  ;;  %p120_p3 = scmp.ne.s32.totalorder %s3584_s19, %s3580_s18 }
  0x17   : > { %p4755_p4 = scmp.eq.s32.totalorder %s3732_s25, 0  ;;  %p146_p5 = scmp.ne.s32.totalorder %s3572_s16, %s3568_s15 }
  0x18   : > { %p2367_p6 = scmp.ge.s32.totalorder %s3608_s24, 1  ;;  %p220_p7 = scmp.lt.s32.totalorder %s3608_s24, 9 }
  0x19   : > { %p3741_p8 = por %p4755_p4, %p120_p3  ;;  %p3747_p9 = por %p146_p5, %p4755_p4 }
  0x1a   : > { %p3751_p10 = pnand %p2367_p6, %p220_p7  ;;  %s3611_s29 = smov [#allocation7]  }
  0x1b   : > { %s4778_s26 = scalar_select %p3741_p8, 1, 0 }
  0x1c   : > { %s4779_s27 = scalar_select %p3747_p9, 1, 0 }
  0x1d   : > { %s4780_s28 = scalar_select %p3751_p10, 1, 0 }
  0x1e   : > { %p3143_p11 = pneg %p3751_p10  ;;  %s232_s30 = sshll.u32 %s3611_s29, 4  ;;  %s233_s30 = int_to_ptr.vmem [resolvable:$true] %s232_s30 }
  0x1f   : > { %s3612_s10 = smov [#allocation10]   ;;  %s4782_s1 = sld [smem:[#allocation26_spill]] }
  0x20   : > { %p3759_p12 = pnand %p3143_p11, %p4755_p4  ;;  %s245_s11 = sshll.u32 %s3612_s10, 4  ;;  %s246_s11 = int_to_ptr.vmem [resolvable:$true] %s245_s11 }
  0x22   : > { %s4781_s9 = scalar_select %p3759_p12, 1, 0 }
  0x23   : > { %p3771_p0 = pneg %p3759_p12 }
  0x25   : > { %s3326_s14 = scalar_lea.hbm %s4782_s1, 4096 }
  0x26   : > { %p3327_p13 = scmp.ne.s32.totalorder %s4782_s1, %s3326_s14  ;;  %p3333_p3 = scmp.lt.u32.totalorder %s3326_s14, %s4782_s1 }
  0x28   : > { %p3329_p1 = pnand %p3771_p0, %p3327_p13 }
  0x2a   : > { %p3330_p2 = pneg %p3329_p1 }
  0x2c   : > { %p3335_p5 = pnand %p3333_p3, %p3330_p2 }
  0x2e   : > { %3338 = shalt.err (!%p3335_p5)
}
  0x2f   : > { %s3339_s10 = scalar_lea.vmem %s233_s30, 4096  ;;  %p3347_p4 = scmp.lt.s32.totalorder %s233_s30, %s233_s30 }
  0x30   : > { %p3340_p6 = scmp.ne.s32.totalorder %s233_s30, %s3339_s10  ;;  %p3348_p9 = scmp.lt.s32.totalorder %s3339_s10, %s3339_s10 }
  0x32   : > { %p3342_p7 = pnand %p3340_p6, %p3771_p0  ;;  %p3349_p8 = por %p3348_p9, %p3347_p4 }
  0x34   : > { %p3343_p11 = pneg %p3342_p7 }
  0x36   : > { %p3350_p10 = pnand %p3349_p8, %p3343_p11 }
  0x38   : > { %3353 = shalt.err (!%p3350_p10)
}
  0x39   : > { %s4761_s12 = smov 128   ;;  %s4763_s13 = smov 8  }
  0x3a   : > { %3146 = dma.hbm_to_vmem [thread:$0]  (!%p3759_p12), %s4782_s1, 4096, %s233_s30, [#allocation8], %s4761_s12, %s4761_s12, %s4763_s13  }
  0x3b   : > { %s4784_s2 = sld [smem:[#allocation27_spill]] }
  0x41   : > { %s3354_s18 = scalar_lea.hbm %s4784_s2, 2048 }
  0x42   : > { %p3355_p4 = scmp.ne.s32.totalorder %s4784_s2, %s3354_s18  ;;  %p3361_p10 = scmp.lt.u32.totalorder %s3354_s18, %s4784_s2 }
  0x44   : > { %p3357_p8 = pnand %p3355_p4, %p3771_p0 }
  0x46   : > { %p3358_p9 = pneg %p3357_p8 }
  0x48   : > { %p3363_p13 = pnand %p3361_p10, %p3358_p9 }
  0x4a   : > { %3366 = shalt.err (!%p3363_p13)
}
  0x4b   : > { %s3367_s7 = scalar_lea.vmem %s246_s11, 2048  ;;  %p3375_p5 = scmp.lt.s32.totalorder %s246_s11, %s246_s11 }
  0x4c   : > { %p3368_p1 = scmp.ne.s32.totalorder %s246_s11, %s3367_s7  ;;  %p3376_p6 = scmp.lt.s32.totalorder %s3367_s7, %s3367_s7 }
  0x4e   : > { %p3370_p2 = pnand %p3368_p1, %p3771_p0  ;;  %p3377_p7 = por %p3376_p6, %p3375_p5 }
  0x50   : > { %p3371_p3 = pneg %p3370_p2 }
  0x52   : > { %p3378_p11 = pnand %p3377_p7, %p3371_p3 }
  0x54   : > { %3381 = shalt.err (!%p3378_p11)
}
  0x55   : > { %3149 = dma.hbm_to_vmem [thread:$0]  (!%p3759_p12), %s4784_s2, 2048, %s246_s11, [#allocation11], %s4761_s12, %s4761_s12, %s4763_s13  }
  0x56   : > { %s34_s0 = sadd.s32 1, %s3600_s22  ;;  %s107_s30 = sadd.s32 1, %s3588_s20 }
  0x57   : > { %p3813_p4 = scmp.ge.s32.totalorder %s34_s0, 2  ;;  %p114_p8 = scmp.ne.s32.totalorder %s3588_s20, %s3584_s19 }
  0x58   : > { %p4767_p9 = scmp.eq.s32.totalorder %s3608_s24, 0  ;;  %p4766_p10 = scmp.lt.s32.totalorder %s3608_s24, 8 }
  0x59   : > { %s4785_s8 = scalar_select %p3813_p4, 1, 0 }
  0x5a   : > { %s4826_s0 = smov (%p3813_p4, %s34_s0), 0  ;;  %p116_p13 = por %p4767_p9, %p114_p8 }
  0x5b   : > { %4786 = sst [smem:[#allocation25_spill]] %s4826_s0  ;;  %s278_s14 = sand.u32 1, %s3608_s24  }
  0x5c   : > { %s104_s15 = ssub.s32 %s3600_s22, %s4826_s0  ;;  %s280_s11 = sand.u32 1, %s3588_s20  }
  0x5d   : > { %p105_p1 = scmp.eq.s32.totalorder %s104_s15, 0  ;;  %s2372_s18 = sshll.u32 %s280_s11, 7 }
  0x5e   : > { %s2449_s10 = sshll.u32 %s3600_s22, 11  ;;  %s4787_s4 = sld [smem:[#allocation29_spill]] }
  0x5f   : > { %s3833_s7 = scalar_select %p105_p1, %s3588_s20, %s107_s30  }
  0x60   : > { %s282_s13 = scalar_lea.vmem [#allocation12], %s2372_s18  ;;  %p3842_p2 = pnand %p4766_p10, %p116_p13 }
  0x61   : > { %s290_s1 = sshll.u32 %s282_s13, 4  ;;  %s3615_s30 = smov [#allocation14]   ;;  %s3846_s1 = int_to_ptr.vmem [resolvable:$true] %s290_s1 }
  0x62   : > { %s3848_s15 = sshll.u32 %s3615_s30, 4  ;;  %s3850_s11 = scalar_lea.sflag [#allocation8], %s278_s14  ;;  %s262_s15 = int_to_ptr.vmem [resolvable:$true] %s3848_s15 }
  0x63   : > { %p3384_p5 = pneg %p3842_p2 }
  0x64   : > { %s3838_s12 = scalar_lea.hbm %s4787_s4, %s2449_s10  ;;  %s3387_s3 = scalar_lea.hbm %s4787_s4, 4096 }
  0x65   : > { %s3382_s10 = scalar_lea.hbm %s3838_s12, 2048  ;;  %p3388_p11 = scmp.lt.u32.totalorder %s3838_s12, %s4787_s4 }
  0x66   : > { %p3383_p3 = scmp.ne.s32.totalorder %s3838_s12, %s3382_s10  ;;  %p3389_p8 = scmp.lt.u32.totalorder %s3387_s3, %s3382_s10 }
  0x67   : > { %p3391_p1 = scmp.lt.u32.totalorder %s3382_s10, %s3838_s12 }
  0x68   : > { %p3385_p6 = pnand %p3384_p5, %p3383_p3  ;;  %p3390_p13 = por %p3389_p8, %p3388_p11 }
  0x6a   : > { %p3386_p7 = pneg %p3385_p6  ;;  %p3392_p10 = por %p3391_p1, %p3390_p13 }
  0x6c   : > { %p3393_p9 = pnand %p3392_p10, %p3386_p7 }
  0x6e   : > { %3396 = shalt.err (!%p3393_p9)
}
  0x6f   : > { %s3397_s14 = scalar_lea.vmem %s3846_s1, 2048  ;;  %s3616_s30 = smov [#allocation12]  }
  0x70   : > { %p3398_p3 = scmp.ne.s32.totalorder %s3846_s1, %s3397_s14  ;;  %s3402_s13 = sshll.u32 %s3616_s30, 4  ;;  %s3403_s13 = int_to_ptr.vmem [resolvable:$false] %s3402_s13 }
  0x71   : > { %s3404_s0 = scalar_lea.vmem %s3403_s13, 4096  ;;  %p3405_p12 = scmp.lt.s32.totalorder %s3846_s1, %s3403_s13 }
  0x72   : > { %p3400_p6 = pnand %p3398_p3, %p3384_p5  ;;  %p3406_p11 = scmp.lt.s32.totalorder %s3404_s0, %s3397_s14 }
  0x74   : > { %p3401_p4 = pneg %p3400_p6  ;;  %p3407_p8 = por %p3406_p11, %p3405_p12 }
  0x76   : > { %p3408_p13 = pnand %p3407_p8, %p3401_p4 }
  0x78   : > { %3411 = shalt.err (!%p3408_p13)
}
  0x79   : > { %s4789_s10 = smov 8   ;;  %s4790_s18 = smov 128  }
  0x7a   : > { %3156 = dma.hbm_to_vmem [thread:$0]  (!%p3842_p2), %s3838_s12, 2048, %s3846_s1, %s3850_s11, %s4790_s18, %s4790_s18, %s4789_s10  }
  0x7b   : > { %s3412_s30 = scalar_lea.hbm %s4751_s6, 2048 }
  0x7c   : > { %p3413_p12 = scmp.ne.s32.totalorder %s4751_s6, %s3412_s30  ;;  %p3419_p10 = scmp.lt.u32.totalorder %s3412_s30, %s4751_s6 }
  0x7e   : > { %p3415_p4 = pnand %p3413_p12, %p3771_p0 }
  0x80   : > { %p3416_p9 = pneg %p3415_p4 }
  0x82   : > { %p3421_p5 = pnand %p3419_p10, %p3416_p9 }
  0x84   : > { %3424 = shalt.err (!%p3421_p5)
}
  0x85   : > { %s3425_s4 = scalar_lea.vmem %s262_s15, 2048  ;;  %p3433_p3 = scmp.lt.s32.totalorder %s262_s15, %s262_s15 }
  0x86   : > { %p3426_p2 = scmp.ne.s32.totalorder %s262_s15, %s3425_s4  ;;  %p3434_p6 = scmp.lt.s32.totalorder %s3425_s4, %s3425_s4 }
  0x88   : > { %p3428_p7 = pnand %p3426_p2, %p3771_p0  ;;  %p3435_p11 = por %p3434_p6, %p3433_p3 }
  0x8a   : > { %p3429_p1 = pneg %p3428_p7 }
  0x8c   : > { %p3436_p8 = pnand %p3435_p11, %p3429_p1 }
  0x8e   : > { %3439 = shalt.err (!%p3436_p8)
}
  0x8f   : > { %p4791_p13 = scmp.ne.s32.totalorder %s4781_s9, 0  ;;  %s133_s4 = sadd.s32 1, %s3576_s17 }
  0x90   : > { %s37_s9 = sadd.s32 1, %s3604_s23  ;;  %p140_p0 = scmp.ne.s32.totalorder %s3576_s17, %s3572_s16 }
  0x91   : > { %3152 = dma.hbm_to_vmem [thread:$0]  (!%p4791_p13), %s4751_s6, 2048, %s262_s15, [#allocation11], %s4790_s18, %s4790_s18, %s4789_s10  }
  0x92   : > { %p4792_p12 = scmp.ne.s32.totalorder %s4785_s8, 0  ;;  %p4793_p4 = scmp.eq.s32.totalorder %s3608_s24, 0 }
  0x93   : > { %s302_s29 = sand.u32 1, %s3576_s17   ;;  %s2450_s21 = sshll.u32 %s3604_s23, 10 }
  0x94   : > { %s4828_s9 = smov (!%p4792_p12, %s37_s9), %s3604_s23  ;;  %p142_p9 = por %p140_p0, %p4793_p4 }
  0x95   : > { %p39_p10 = scmp.ge.s32.totalorder %s4828_s9, 4  ;;  %s2376_s3 = sshll.u32 %s302_s29, 6 }
  0x96   : > { %s3919_s15 = scalar_lea.hbm %s4750_s5, %s2450_s21  ;;  %s304_s10 = scalar_lea.vmem [#allocation13], %s2376_s3 }
  0x97   : > { %s4830_s9 = smov (%p39_p10, %s4828_s9), 0  ;;  %s311_s8 = sshll.u32 %s304_s10, 4  ;;  %s3923_s8 = int_to_ptr.vmem [resolvable:$true] %s311_s8 }
  0x98   : > { %s130_s18 = ssub.s32 %s3604_s23, %s4830_s9  ;;  %p4794_p2 = scmp.lt.s32.totalorder %s3608_s24, 8 }
  0x99   : > { %p131_p5 = scmp.eq.s32.totalorder %s130_s18, 0  ;;  %s3440_s0 = scalar_lea.hbm %s3919_s15, 1024 }
  0x9a   : > { %p3927_p7 = pnand %p4794_p2, %p142_p9  ;;  %p3441_p1 = scmp.ne.s32.totalorder %s3919_s15, %s3440_s0 }
  0x9b   : > { %s3932_s2 = scalar_select %p131_p5, %s3576_s17, %s133_s4  }
  0x9c   : > { %p3442_p3 = pneg %p3927_p7  ;;  %s3445_s29 = scalar_lea.hbm %s4750_s5, 4096 }
  0x9d   : > { %p3446_p8 = scmp.lt.u32.totalorder %s3919_s15, %s4750_s5  ;;  %p3447_p13 = scmp.lt.u32.totalorder %s3445_s29, %s3440_s0 }
  0x9e   : > { %p3443_p6 = pnand %p3442_p3, %p3441_p1  ;;  %p3449_p12 = scmp.lt.u32.totalorder %s3440_s0, %s3919_s15 }
  0x9f   : > { %p3448_p0 = por %p3447_p13, %p3446_p8 }
  0xa0   : > { %p3444_p11 = pneg %p3443_p6 }
  0xa1   : > { %p3450_p4 = por %p3449_p12, %p3448_p0 }
  0xa3   : > { %p3451_p9 = pnand %p3450_p4, %p3444_p11 }
  0xa5   : > { %3454 = shalt.err (!%p3451_p9)
}
  0xa6   : > { %s3455_s4 = scalar_lea.vmem %s3923_s8, 1024  ;;  %s3617_s30 = smov [#allocation13]  }
  0xa7   : > { %p3456_p10 = scmp.ne.s32.totalorder %s3923_s8, %s3455_s4  ;;  %s3460_s14 = sshll.u32 %s3617_s30, 4  ;;  %s3461_s14 = int_to_ptr.vmem [resolvable:$false] %s3460_s14 }
  0xa8   : > { %s3462_s10 = scalar_lea.vmem %s3461_s14, 2048  ;;  %p3463_p1 = scmp.lt.s32.totalorder %s3923_s8, %s3461_s14 }
  0xa9   : > { %p3458_p5 = pnand %p3456_p10, %p3442_p3  ;;  %p3464_p6 = scmp.lt.s32.totalorder %s3462_s10, %s3455_s4 }
  0xab   : > { %p3459_p2 = pneg %p3458_p5  ;;  %p3465_p8 = por %p3464_p6, %p3463_p1 }
  0xad   : > { %p3466_p13 = pnand %p3465_p8, %p3459_p2 }
  0xaf   : > { %3469 = shalt.err (!%p3466_p13)
}
  0xb0   : > { %s3618_s18 = smov 64   ;;  %s3619_s0 = smov 4  }
  0xb1   : > { %3159 = dma.hbm_to_vmem [thread:$0]  (!%p3927_p7), %s3919_s15, 1024, %s3923_s8, %s3850_s11, %s3618_s18, %s3618_s18, %s3619_s0  }
  0xb2   : > { %p4796_p3 = scmp.ne.s32.totalorder %s4780_s28, 0 }
  0xb3   : > { %p4797_p11 = scmp.eq.s32.totalorder (!%p4796_p3), %s3732_s25, 0 }
  0xb4   : > { %323 = sbr.rel (%p4796_p3) target bundleno = 2133 (0x855), region = 48 }
  0xbb   : > { %3543 = dma.done.wait (%p4797_p11), [#allocation8], 4096   ;;  %p4798_p0 = pmov %p4797_p11 }
  0xbd   : > { %3545 = vsyncadd (%p4798_p0), [#allocation8], 4294963200  ;;  %p4799_p12 = pmov %p4798_p0 }
  0xbe   : > { %p4800_p4 = pmov %p4798_p0 }
  0xbf   : > { %3547 = dma.done.wait (%p4799_p12), [#allocation11], 2048  }
  0xc0   : > { %3549 = vsyncadd (%p4800_p4), [#allocation11], 4294965248  ;;  %s333_s13 = sand.u32 1, %s3732_s25   ;;  %s335_s11 = sand.u32 1, %s3584_s19  }
  0xc1   : > { %s2382_s15 = sshll.u32 %s335_s11, 7  ;;  %s334_s28 = scalar_lea.sflag [#allocation8], %s333_s13 }
  0xc2   : > { %s3972_s8 = scalar_lea.vmem [#allocation12], %s2382_s15  ;;  %p4801_p7 = scmp.ne.s32.totalorder %s4778_s26, 0 }
  0xc4   : > { %3551 = dma.done.wait (%p4801_p7), %s334_s28, 2048  }
  0xc5   : > { %3553 = vsyncadd (%p4801_p7), %s334_s28, 4294965248  ;;  %s344_s1 = sand.u32 1, %s3572_s16   ;;  %p4802_p9 = scmp.ne.s32.totalorder %s4779_s27, 0 }
  0xc6   : > { %s2383_s12 = sshll.u32 %s344_s1, 6 }
  0xc7   : > { %s3979_s29 = scalar_lea.vmem [#allocation13], %s2383_s12 }
  0xc8   : > { %3555 = dma.done.wait (%p4802_p9), %s334_s28, 1024  }
  0xc9   : > { %3557 = vsyncadd (%p4802_p9), %s334_s28, 4294966272  ;;  %p4803_p10 = pmov %p4798_p0 }
  0xca   : > { %p4804_p5 = pmov %p4798_p0 }
  0xcb   : > { %3559 = dma.done.wait (%p4803_p10), [#allocation11], 2048  }
  0xcc   : > { %3561 = vsyncadd (%p4804_p5), [#allocation11], 4294965248  ;;  %s4805_s3 = sld [smem:[#allocation23_spill]]  ;;  %s4806_s26 = sld [smem:[#allocation24_spill]] }
  0xd2   : > { %s3990_s21 = sshll.u32 %s4805_s3, 7  ;;  %p384_p2 = scmp.eq.s32.totalorder %s4806_s26, 0 }
  0xd3   : > { %p385_p1 = scmp.eq.s32.totalorder %s4805_s3, 0 }
  0xd5   : > { %p386_p6 = pnand %p385_p1, %p384_p2 }
  0xd6   : > { %v422_v0 = vld [vmem:[#allocation10] sm:$0xff] (!%p386_p6)  ;;  %v423_v1 = vld [vmem:[#allocation10 + $0x8] sm:$0xff] (!%p386_p6)  ;;  %v424_v2 = vld [vmem:[#allocation10 + $0x10] sm:$0xff] (!%p386_p6)  ;;  %s4807_s30 = sld [smem:[#allocation28_spill]] (!%p386_p6) }
  0xd7   : > { %389 = sbr.rel (%p386_p6) target bundleno = 495 (0x1ef), region = 72  ;;  %v2979_v3 = vpack.c.bf16 (!%p386_p6), %v423_v1, %v422_v0  ;;  %v425_v4 = vld [vmem:[#allocation10 + $0x18] sm:$0xff] (!%p386_p6)  ;;  %v426_v6 = vld [vmem:[#allocation10 + $0x20] sm:$0xff] (!%p386_p6)  ;;  %v427_v7 = vld [vmem:[#allocation10 + $0x28] sm:$0xff] (!%p386_p6) }
  0xd8   : > { %v2983_v5 = vpack.c.bf16 (!%p386_p6), %v425_v4, %v424_v2  ;;  %v2987_v8 = vpack.c.bf16 (!%p386_p6), %v427_v7, %v426_v6  ;;  %v390_v9 = vld [vmem:[#allocation7] sm:$0xff] (!%p386_p6)  ;;  %v428_v11 = vld [vmem:[#allocation10 + $0x30] sm:$0xff] (!%p386_p6)  ;;  %v429_v12 = vld [vmem:[#allocation10 + $0x38] sm:$0xff] (!%p386_p6) }
  0xd9   : > { %2980 = vmatprep.subr.bf16.mxu0 (!%p386_p6), %v2979_v3  ;;  %3075 = vmatprep.subr.bf16.mxu1 (!%p386_p6), %v2979_v3  ;;  %v406_v10 = vld [vmem:[#allocation7 + $0x80] sm:$0xff] (!%p386_p6)  ;;  %v2991_v13 = vpack.c.bf16 (!%p386_p6), %v429_v12, %v428_v11  ;;  %v431_v15 = vld [vmem:[#allocation10 + $0x48] sm:$0xff] (!%p386_p6)  ;;  %v432_v17 = vld [vmem:[#allocation10 + $0x50] sm:$0xff] (!%p386_p6) }
  0xda   : > { %2982 = vmatpush3.bf16.msra.mxu0 (!%p386_p6), %v2979_v3  ;;  %3083 = vmatpush3.bf16.msra.mxu1 (!%p386_p6), %v2979_v3  ;;  %v430_v14 = vld [vmem:[#allocation10 + $0x40] sm:$0xff] (!%p386_p6)  ;;  %v433_v18 = vld [vmem:[#allocation10 + $0x58] sm:$0xff] (!%p386_p6)  ;;  %v435_v21 = vld [vmem:[#allocation10 + $0x68] sm:$0xff] (!%p386_p6) }
  0xdb   : > { %2984 = vmatprep.subr.bf16.mxu0 (!%p386_p6), %v2983_v5  ;;  %3076 = vmatprep.subr.bf16.mxu1 (!%p386_p6), %v2983_v5  ;;  %v2995_v16 = vpack.c.bf16 (!%p386_p6), %v431_v15, %v430_v14  ;;  %v2999_v19 = vpack.c.bf16 (!%p386_p6), %v433_v18, %v432_v17  ;;  %v434_v20 = vld [vmem:[#allocation10 + $0x60] sm:$0xff] (!%p386_p6)  ;;  %v436_v23 = vld [vmem:[#allocation10 + $0x70] sm:$0xff] (!%p386_p6)  ;;  %v437_v24 = vld [vmem:[#allocation10 + $0x78] sm:$0xff] (!%p386_p6) }
  0xdc   : > { %2755 = vmatprep.mubr.f32.mxu0 (!%p386_p6), %v390_v9  ;;  %2779 = vmatprep.mubr.f32.mxu1 (!%p386_p6), %v406_v10  ;;  %v3003_v22 = vpack.c.bf16 (!%p386_p6), %v435_v21, %v434_v20  ;;  %v3007_v25 = vpack.c.bf16 (!%p386_p6), %v437_v24, %v436_v23  ;;  %v391_v26 = vld [vmem:[#allocation7 + $0x8] sm:$0xff] (!%p386_p6)  ;;  %v392_v28 = vld [vmem:[#allocation7 + $0x10] sm:$0xff] (!%p386_p6)  ;;  %v393_v30 = vld [vmem:[#allocation7 + $0x18] sm:$0xff] (!%p386_p6) }
  0xdd   : > { %v407_v27 = vld [vmem:[#allocation7 + $0x88] sm:$0xff] (!%p386_p6)  ;;  %v408_v29 = vld [vmem:[#allocation7 + $0x90] sm:$0xff] (!%p386_p6)  ;;  %v409_v31 = vld [vmem:[#allocation7 + $0x98] sm:$0xff] (!%p386_p6) }
  0xde   : > { %2986 = vmatpush3.bf16.msra.mxu0 %v2983_v5  ;;  %3084 = vmatpush3.bf16.msra.mxu1 %v2983_v5  ;;  %v394_v32 = vld [vmem:[#allocation7 + $0x20] sm:$0xff]  ;;  %v395_v34 = vld [vmem:[#allocation7 + $0x28] sm:$0xff]  ;;  %v396_v36 = vld [vmem:[#allocation7 + $0x30] sm:$0xff] }
  0xdf   : > { %2988 = vmatprep.subr.bf16.mxu0 %v2987_v8  ;;  %3077 = vmatprep.subr.bf16.mxu1 %v2987_v8  ;;  %v410_v33 = vld [vmem:[#allocation7 + $0xa0] sm:$0xff]  ;;  %v411_v35 = vld [vmem:[#allocation7 + $0xa8] sm:$0xff]  ;;  %v412_v37 = vld [vmem:[#allocation7 + $0xb0] sm:$0xff] }
  0xe0   : > { %v397_v38 = vld [vmem:[#allocation7 + $0x38] sm:$0xff]  ;;  %v398_v40 = vld [vmem:[#allocation7 + $0x40] sm:$0xff]  ;;  %v399_v42 = vld [vmem:[#allocation7 + $0x48] sm:$0xff] }
  0xe1   : > { %v413_v39 = vld [vmem:[#allocation7 + $0xb8] sm:$0xff]  ;;  %v414_v41 = vld [vmem:[#allocation7 + $0xc0] sm:$0xff]  ;;  %v415_v43 = vld [vmem:[#allocation7 + $0xc8] sm:$0xff] }
  0xe2   : > { %2990 = vmatpush3.bf16.msra.mxu0 %v2987_v8  ;;  %3085 = vmatpush3.bf16.msra.mxu1 %v2987_v8  ;;  %v400_v44 = vld [vmem:[#allocation7 + $0x50] sm:$0xff]  ;;  %v401_v46 = vld [vmem:[#allocation7 + $0x58] sm:$0xff]  ;;  %v402_v48 = vld [vmem:[#allocation7 + $0x60] sm:$0xff] }
  0xe3   : > { %2992 = vmatprep.subr.bf16.mxu0 %v2991_v13  ;;  %3078 = vmatprep.subr.bf16.mxu1 %v2991_v13  ;;  %v416_v45 = vld [vmem:[#allocation7 + $0xd0] sm:$0xff]  ;;  %v417_v47 = vld [vmem:[#allocation7 + $0xd8] sm:$0xff]  ;;  %v418_v49 = vld [vmem:[#allocation7 + $0xe0] sm:$0xff] }
  0xe4   : > { %v403_v50 = vld [vmem:[#allocation7 + $0x68] sm:$0xff]  ;;  %v404_v52 = vld [vmem:[#allocation7 + $0x70] sm:$0xff]  ;;  %v405_v54 = vld [vmem:[#allocation7 + $0x78] sm:$0xff] }
  0xe5   : > { %v419_v51 = vld [vmem:[#allocation7 + $0xe8] sm:$0xff]  ;;  %v420_v53 = vld [vmem:[#allocation7 + $0xf0] sm:$0xff]  ;;  %v421_v55 = vld [vmem:[#allocation7 + $0xf8] sm:$0xff] }
  0xe6   : > { %2994 = vmatpush3.bf16.msra.mxu0 %v2991_v13  ;;  %3086 = vmatpush3.bf16.msra.mxu1 %v2991_v13  ;;  %v3997_v56 = vld [vmem:[%s4807_s30] ss:$0 sm:$0xff] }
  0xe7   : > { %2996 = vmatprep.subr.bf16.mxu0 %v2995_v16  ;;  %3079 = vmatprep.subr.bf16.mxu1 %v2995_v16 }
  0xea   : > { %2998 = vmatpush3.bf16.msra.mxu0 %v2995_v16  ;;  %3087 = vmatpush3.bf16.msra.mxu1 %v2995_v16 }
  0xeb   : > { %3000 = vmatprep.subr.bf16.mxu0 %v2999_v19  ;;  %3080 = vmatprep.subr.bf16.mxu1 %v2999_v19 }
  0xee   : > { %3002 = vmatpush3.bf16.msra.mxu0 %v2999_v19  ;;  %3088 = vmatpush3.bf16.msra.mxu1 %v2999_v19 }
  0xef   : > { %3004 = vmatprep.subr.bf16.mxu0 %v3003_v22  ;;  %3081 = vmatprep.subr.bf16.mxu1 %v3003_v22 }
  0xf2   : > { %3006 = vmatpush3.bf16.msra.mxu0 %v3003_v22  ;;  %3089 = vmatpush3.bf16.msra.mxu1 %v3003_v22 }
  0xf3   : > { %3008 = vmatprep.subr.bf16.mxu0 %v3007_v25  ;;  %3082 = vmatprep.subr.bf16.mxu1 %v3007_v25 }
  0xf6   : > { %3010 = vmatpush3.bf16.msra.mxu0 %v3007_v25  ;;  %3090 = vmatpush3.bf16.msra.mxu1 %v3007_v25 }
  0xf9   : > { %2756 = vmatmul.mubr.f32.vlgmr.msra.gmra.mrb[0].mxu0 %v391_v26  ;;  %2780 = vmatmul.mubr.f32.vlgmr.msra.gmra.mrb[0].mxu1 %v407_v27 }
  0xfa   : > { %2758 = vmatprep.mubr.f32.mxu0 %v392_v28  ;;  %2782 = vmatprep.mubr.f32.mxu1 %v408_v29 }
  0xfd   : > { %2759 = vmatmul.mubr.f32.gmra.mrb[2].mxu0 %v393_v30  ;;  %2783 = vmatmul.mubr.f32.gmra.mrb[2].mxu1 %v409_v31 }
  0xfe   : > { %2761 = vmatprep.mubr.f32.mxu0 %v394_v32  ;;  %2785 = vmatprep.mubr.f32.mxu1 %v410_v33 }
 0x101   : > { %2762 = vmatmul.mubr.f32.gmra.mrb[4].mxu0 %v395_v34  ;;  %2786 = vmatmul.mubr.f32.gmra.mrb[4].mxu1 %v411_v35 }
 0x102   : > { %2764 = vmatprep.mubr.f32.mxu0 %v396_v36  ;;  %2788 = vmatprep.mubr.f32.mxu1 %v412_v37 }
 0x105   : > { %2765 = vmatmul.mubr.f32.gmra.mrb[6].mxu0 %v397_v38  ;;  %2789 = vmatmul.mubr.f32.gmra.mrb[6].mxu1 %v413_v39 }
 0x106   : > { %2767 = vmatprep.mubr.f32.mxu0 %v398_v40  ;;  %2791 = vmatprep.mubr.f32.mxu1 %v414_v41 }
 0x109   : > { %2768 = vmatmul.mubr.f32.gmra.mrb[8].mxu0 %v399_v42  ;;  %2792 = vmatmul.mubr.f32.gmra.mrb[8].mxu1 %v415_v43 }
 0x10a   : > { %2770 = vmatprep.mubr.f32.mxu0 %v400_v44  ;;  %2794 = vmatprep.mubr.f32.mxu1 %v416_v45 }
 0x10d   : > { %2771 = vmatmul.mubr.f32.gmra.mrb[10].mxu0 %v401_v46  ;;  %2795 = vmatmul.mubr.f32.gmra.mrb[10].mxu1 %v417_v47 }
 0x10e   : > { %2773 = vmatprep.mubr.f32.mxu0 %v402_v48  ;;  %2797 = vmatprep.mubr.f32.mxu1 %v418_v49 }
 0x111   : > { %2774 = vmatmul.mubr.f32.gmra.mrb[12].mxu0 %v403_v50  ;;  %2798 = vmatmul.mubr.f32.gmra.mrb[12].mxu1 %v419_v51 }
 0x112   : > { %2776 = vmatprep.mubr.f32.mxu0 %v404_v52  ;;  %2800 = vmatprep.mubr.f32.mxu1 %v420_v53 }
 0x115   : > { %2777 = vmatmul.mubr.f32.gmra.mrb[14].mxu0 %v405_v54  ;;  %2801 = vmatmul.mubr.f32.gmra.mrb[14].mxu1 %v421_v55 }
 0x1cc   : > { %v2757_v57 = vpop.f32.mrb[0].mxu0  ;;  %v2781_v58 = vpop.f32.mrb[0].mxu1 }
 0x1cd   : > { %v517_v59 = vadd.f32 %v2757_v57, %v3997_v56  ;;  %v597_v60 = vadd.f32 %v2781_v58, %v3997_v56  ;;  %v511_v61 = vpop.f32.mrb[1].mxu0  ;;  %v591_v62 = vpop.f32.mrb[1].mxu1 }
 0x1ce   : > { %v512_v63 = vadd.f32 %v3997_v56, %v511_v61  ;;  %v592_v0 = vadd.f32 %v3997_v56, %v591_v62 }
 0x1cf   : > { %671 = vst [vmem:[#allocation4 + $0x8] sm:$0xff] %v517_v59  ;;  %703 = vst [vmem:[#allocation2 + $0x8] sm:$0xff] %v517_v59 }
 0x1d0   : > { %687 = vst [vmem:[#allocation4 + $0x88] sm:$0xff] %v597_v60  ;;  %719 = vst [vmem:[#allocation2 + $0x88] sm:$0xff] %v597_v60  ;;  %v2760_v1 = vpop.f32.mrb[2].mxu0  ;;  %v2784_v2 = vpop.f32.mrb[2].mxu1 }
 0x1d1   : > { %670 = vst [vmem:[#allocation4] sm:$0xff] %v512_v63  ;;  %702 = vst [vmem:[#allocation2] sm:$0xff] %v512_v63  ;;  %v527_v3 = vadd.f32 %v2760_v1, %v3997_v56  ;;  %v607_v4 = vadd.f32 %v2784_v2, %v3997_v56  ;;  %v521_v5 = vpop.f32.mrb[3].mxu0  ;;  %v601_v6 = vpop.f32.mrb[3].mxu1 }
 0x1d2   : > { %686 = vst [vmem:[#allocation4 + $0x80] sm:$0xff] %v592_v0  ;;  %718 = vst [vmem:[#allocation2 + $0x80] sm:$0xff] %v592_v0  ;;  %v522_v7 = vadd.f32 %v3997_v56, %v521_v5  ;;  %v602_v8 = vadd.f32 %v3997_v56, %v601_v6 }
 0x1d3   : > { %673 = vst [vmem:[#allocation4 + $0x18] sm:$0xff] %v527_v3  ;;  %705 = vst [vmem:[#allocation2 + $0x18] sm:$0xff] %v527_v3 }
 0x1d4   : > { %689 = vst [vmem:[#allocation4 + $0x98] sm:$0xff] %v607_v4  ;;  %721 = vst [vmem:[#allocation2 + $0x98] sm:$0xff] %v607_v4  ;;  %v2763_v9 = vpop.f32.mrb[4].mxu0  ;;  %v2787_v10 = vpop.f32.mrb[4].mxu1 }
 0x1d5   : > { %672 = vst [vmem:[#allocation4 + $0x10] sm:$0xff] %v522_v7  ;;  %704 = vst [vmem:[#allocation2 + $0x10] sm:$0xff] %v522_v7  ;;  %v537_v11 = vadd.f32 %v2763_v9, %v3997_v56  ;;  %v617_v12 = vadd.f32 %v2787_v10, %v3997_v56  ;;  %v531_v13 = vpop.f32.mrb[5].mxu0  ;;  %v611_v14 = vpop.f32.mrb[5].mxu1 }
 0x1d6   : > { %688 = vst [vmem:[#allocation4 + $0x90] sm:$0xff] %v602_v8  ;;  %720 = vst [vmem:[#allocation2 + $0x90] sm:$0xff] %v602_v8  ;;  %v532_v15 = vadd.f32 %v3997_v56, %v531_v13  ;;  %v612_v16 = vadd.f32 %v3997_v56, %v611_v14 }
 0x1d7   : > { %675 = vst [vmem:[#allocation4 + $0x28] sm:$0xff] %v537_v11  ;;  %707 = vst [vmem:[#allocation2 + $0x28] sm:$0xff] %v537_v11 }
 0x1d8   : > { %691 = vst [vmem:[#allocation4 + $0xa8] sm:$0xff] %v617_v12  ;;  %723 = vst [vmem:[#allocation2 + $0xa8] sm:$0xff] %v617_v12  ;;  %v2766_v17 = vpop.f32.mrb[6].mxu0  ;;  %v2790_v18 = vpop.f32.mrb[6].mxu1 }
 0x1d9   : > { %674 = vst [vmem:[#allocation4 + $0x20] sm:$0xff] %v532_v15  ;;  %706 = vst [vmem:[#allocation2 + $0x20] sm:$0xff] %v532_v15  ;;  %v547_v19 = vadd.f32 %v2766_v17, %v3997_v56  ;;  %v627_v20 = vadd.f32 %v2790_v18, %v3997_v56  ;;  %v541_v21 = vpop.f32.mrb[7].mxu0  ;;  %v621_v22 = vpop.f32.mrb[7].mxu1 }
 0x1da   : > { %690 = vst [vmem:[#allocation4 + $0xa0] sm:$0xff] %v612_v16  ;;  %722 = vst [vmem:[#allocation2 + $0xa0] sm:$0xff] %v612_v16  ;;  %v542_v23 = vadd.f32 %v3997_v56, %v541_v21  ;;  %v622_v24 = vadd.f32 %v3997_v56, %v621_v22 }
 0x1db   : > { %677 = vst [vmem:[#allocation4 + $0x38] sm:$0xff] %v547_v19  ;;  %709 = vst [vmem:[#allocation2 + $0x38] sm:$0xff] %v547_v19 }
 0x1dc   : > { %693 = vst [vmem:[#allocation4 + $0xb8] sm:$0xff] %v627_v20  ;;  %725 = vst [vmem:[#allocation2 + $0xb8] sm:$0xff] %v627_v20  ;;  %v2769_v25 = vpop.f32.mrb[8].mxu0  ;;  %v2793_v26 = vpop.f32.mrb[8].mxu1 }
 0x1dd   : > { %676 = vst [vmem:[#allocation4 + $0x30] sm:$0xff] %v542_v23  ;;  %708 = vst [vmem:[#allocation2 + $0x30] sm:$0xff] %v542_v23  ;;  %v557_v27 = vadd.f32 %v2769_v25, %v3997_v56  ;;  %v637_v28 = vadd.f32 %v2793_v26, %v3997_v56  ;;  %v551_v29 = vpop.f32.mrb[9].mxu0  ;;  %v631_v30 = vpop.f32.mrb[9].mxu1 }
 0x1de   : > { %692 = vst [vmem:[#allocation4 + $0xb0] sm:$0xff] %v622_v24  ;;  %724 = vst [vmem:[#allocation2 + $0xb0] sm:$0xff] %v622_v24  ;;  %v552_v31 = vadd.f32 %v3997_v56, %v551_v29  ;;  %v632_v32 = vadd.f32 %v3997_v56, %v631_v30 }
 0x1df   : > { %679 = vst [vmem:[#allocation4 + $0x48] sm:$0xff] %v557_v27  ;;  %711 = vst [vmem:[#allocation2 + $0x48] sm:$0xff] %v557_v27 }
 0x1e0   : > { %695 = vst [vmem:[#allocation4 + $0xc8] sm:$0xff] %v637_v28  ;;  %727 = vst [vmem:[#allocation2 + $0xc8] sm:$0xff] %v637_v28  ;;  %v2772_v33 = vpop.f32.mrb[10].mxu0  ;;  %v2796_v34 = vpop.f32.mrb[10].mxu1 }
 0x1e1   : > { %678 = vst [vmem:[#allocation4 + $0x40] sm:$0xff] %v552_v31  ;;  %710 = vst [vmem:[#allocation2 + $0x40] sm:$0xff] %v552_v31  ;;  %v567_v35 = vadd.f32 %v2772_v33, %v3997_v56  ;;  %v647_v36 = vadd.f32 %v2796_v34, %v3997_v56  ;;  %v561_v37 = vpop.f32.mrb[11].mxu0  ;;  %v641_v38 = vpop.f32.mrb[11].mxu1 }
 0x1e2   : > { %694 = vst [vmem:[#allocation4 + $0xc0] sm:$0xff] %v632_v32  ;;  %726 = vst [vmem:[#allocation2 + $0xc0] sm:$0xff] %v632_v32  ;;  %v562_v39 = vadd.f32 %v3997_v56, %v561_v37  ;;  %v642_v40 = vadd.f32 %v3997_v56, %v641_v38 }
 0x1e3   : > { %681 = vst [vmem:[#allocation4 + $0x58] sm:$0xff] %v567_v35  ;;  %713 = vst [vmem:[#allocation2 + $0x58] sm:$0xff] %v567_v35 }
 0x1e4   : > { %697 = vst [vmem:[#allocation4 + $0xd8] sm:$0xff] %v647_v36  ;;  %729 = vst [vmem:[#allocation2 + $0xd8] sm:$0xff] %v647_v36  ;;  %v2775_v41 = vpop.f32.mrb[12].mxu0  ;;  %v2799_v42 = vpop.f32.mrb[12].mxu1 }
 0x1e5   : > { %680 = vst [vmem:[#allocation4 + $0x50] sm:$0xff] %v562_v39  ;;  %712 = vst [vmem:[#allocation2 + $0x50] sm:$0xff] %v562_v39  ;;  %v577_v43 = vadd.f32 %v2775_v41, %v3997_v56  ;;  %v657_v44 = vadd.f32 %v2799_v42, %v3997_v56  ;;  %v571_v45 = vpop.f32.mrb[13].mxu0  ;;  %v651_v46 = vpop.f32.mrb[13].mxu1 }
 0x1e6   : > { %696 = vst [vmem:[#allocation4 + $0xd0] sm:$0xff] %v642_v40  ;;  %728 = vst [vmem:[#allocation2 + $0xd0] sm:$0xff] %v642_v40  ;;  %v572_v47 = vadd.f32 %v3997_v56, %v571_v45  ;;  %v652_v48 = vadd.f32 %v3997_v56, %v651_v46 }
 0x1e7   : > { %683 = vst [vmem:[#allocation4 + $0x68] sm:$0xff] %v577_v43  ;;  %715 = vst [vmem:[#allocation2 + $0x68] sm:$0xff] %v577_v43 }
 0x1e8   : > { %699 = vst [vmem:[#allocation4 + $0xe8] sm:$0xff] %v657_v44  ;;  %731 = vst [vmem:[#allocation2 + $0xe8] sm:$0xff] %v657_v44  ;;  %v2778_v49 = vpop.f32.mrb[14].mxu0  ;;  %v2802_v50 = vpop.f32.mrb[14].mxu1 }
 0x1e9   : > { %682 = vst [vmem:[#allocation4 + $0x60] sm:$0xff] %v572_v47  ;;  %714 = vst [vmem:[#allocation2 + $0x60] sm:$0xff] %v572_v47  ;;  %v587_v51 = vadd.f32 %v2778_v49, %v3997_v56  ;;  %v667_v52 = vadd.f32 %v2802_v50, %v3997_v56  ;;  %v581_v53 = vpop.f32.mrb[15].mxu0  ;;  %v661_v54 = vpop.f32.mrb[15].mxu1 }
 0x1ea   : > { %698 = vst [vmem:[#allocation4 + $0xe0] sm:$0xff] %v652_v48  ;;  %730 = vst [vmem:[#allocation2 + $0xe0] sm:$0xff] %v652_v48  ;;  %v582_v55 = vadd.f32 %v3997_v56, %v581_v53  ;;  %v662_v57 = vadd.f32 %v3997_v56, %v661_v54 }
 0x1eb   : > { %685 = vst [vmem:[#allocation4 + $0x78] sm:$0xff] %v587_v51  ;;  %717 = vst [vmem:[#allocation2 + $0x78] sm:$0xff] %v587_v51 }
 0x1ec   : > { %701 = vst [vmem:[#allocation4 + $0xf8] sm:$0xff] %v667_v52  ;;  %733 = vst [vmem:[#allocation2 + $0xf8] sm:$0xff] %v667_v52 }
 0x1ed   : > { %684 = vst [vmem:[#allocation4 + $0x70] sm:$0xff] %v582_v55  ;;  %716 = vst [vmem:[#allocation2 + $0x70] sm:$0xff] %v582_v55 }
 0x1ee   : > { %700 = vst [vmem:[#allocation4 + $0xf0] sm:$0xff] %v662_v57  ;;  %732 = vst [vmem:[#allocation2 + $0xf0] sm:$0xff] %v662_v57 }
 0x1ef PF: > { %s4808_s14 = sld [smem:[#allocation24_spill]]  ;;  %v4035_v56 = vld [vmem:[%s3979_s29] sm:$0xf]  ;;  %v4038_v58 = vld [vmem:[%s3979_s29 + $0x4] sm:$0xf] }
 0x1f0   : > { %v4041_v59 = vld [vmem:[%s3979_s29 + $0x8] sm:$0xf]  ;;  %v4044_v60 = vld [vmem:[%s3979_s29 + $0xc] sm:$0xf]  ;;  %v4047_v61 = vld [vmem:[%s3979_s29 + $0x10] sm:$0xf] }
 0x1f1   : > { %v4050_v62 = vld [vmem:[%s3979_s29 + $0x14] sm:$0xf]  ;;  %v4053_v63 = vld [vmem:[%s3979_s29 + $0x18] sm:$0xf]  ;;  %v4056_v0 = vld [vmem:[%s3979_s29 + $0x1c] sm:$0xf] }
 0x1f2   : > { %v4059_v1 = vld [vmem:[%s3979_s29 + $0x20] sm:$0xf]  ;;  %v4062_v2 = vld [vmem:[%s3979_s29 + $0x24] sm:$0xf]  ;;  %v4065_v3 = vld [vmem:[%s3979_s29 + $0x28] sm:$0xf] }
 0x1f3   : > { %v4068_v4 = vld [vmem:[%s3979_s29 + $0x2c] sm:$0xf]  ;;  %v4071_v5 = vld [vmem:[%s3979_s29 + $0x30] sm:$0xf]  ;;  %v4074_v6 = vld [vmem:[%s3979_s29 + $0x34] sm:$0xf] }
 0x1f4   : > { %v4077_v7 = vld [vmem:[%s3979_s29 + $0x38] sm:$0xf]  ;;  %v4080_v8 = vld [vmem:[%s3979_s29 + $0x3c] sm:$0xf] }
 0x1f5   : > { %s4032_s10 = sld [smem:[#allocation6 + %s4808_s14]]  ;;  %p751_p8 = scmp.lt.s32.totalorder %s4808_s14, 0 }
 0x1f6   : > { %s752_s18 = ssub.s32 0, %s4808_s14 }
 0x1f7   : > { %s2387_s0 = smin.u32 %s4808_s14, %s752_s18 }
 0x1f8   : > { %s754_s13 = sand.u32 1, %s2387_s0  }
 0x1f9   : > { %s755_s11 = ssub.s32 0, %s754_s13 }
 0x1fa   : > { %s4832_s11 = smov (!%p751_p8, %s755_s11), %s754_s13 }
 0x1fb   : > { %p2389_p13 = scmp.lt.s32.totalorder %s4832_s11, 0  ;;  %s761_s15 = sadd.s32 2, %s4832_s11 }
 0x1fd   : > { %s4834_s15 = smov (!%p2389_p13, %s761_s15), %s4832_s11 }
 0x1fe   : > { %p2390_p3 = scmp.ne.s32.totalorder %s4834_s15, 0 }
 0x1ff   : > { %v799_v9 = vld [vmem:[#allocation2 + $0x80] sm:$0xff] (!%p2390_p3)  ;;  %v800_v10 = vld [vmem:[#allocation2 + $0x88] sm:$0xff] (!%p2390_p3)  ;;  %v2407_v12 = vcombine.low (!%p2390_p3), %v4035_v56, %v4038_v58  ;;  %v2408_v13 = vcombine.low (!%p2390_p3), %v4041_v59, %v4044_v60  ;;  %v801_v16 = vld [vmem:[#allocation2 + $0x90] sm:$0xff] (!%p2390_p3)  ;;  %v2409_v25 = vcombine.low (!%p2390_p3), %v4047_v61, %v4050_v62  ;;  %s4121_s28 = scalar_lea.vmem (!%p2390_p3), [#allocation4], %s3990_s21  ;;  %s1226_s1 = ssub.f32 (!%p2390_p3), 1.0, %s4032_s10 }
 0x200   : > { %766 = sbr.rel (%p2390_p3) target bundleno = 1303 (0x517), region = 76  ;;  %v783_v11 = vld [vmem:[#allocation2] sm:$0xff] (!%p2390_p3)  ;;  %v823_v14 = vpack.c.bf16 (!%p2390_p3), %v800_v10, %v799_v9  ;;  %v784_v15 = vld [vmem:[#allocation2 + $0x8] sm:$0xff] (!%p2390_p3)  ;;  %v802_v17 = vld [vmem:[#allocation2 + $0x98] sm:$0xff] (!%p2390_p3)  ;;  %s4216_s12 = scalar_lea.vmem (!%p2390_p3), [#allocation3], %s3990_s21 }
 0x201   : > { %v815_v18 = vpack.c.bf16 (!%p2390_p3), %v784_v15, %v783_v11  ;;  %v824_v19 = vpack.c.bf16 (!%p2390_p3), %v802_v17, %v801_v16  ;;  %v785_v20 = vld [vmem:[#allocation2 + $0x10] sm:$0xff] (!%p2390_p3)  ;;  %v786_v21 = vld [vmem:[#allocation2 + $0x18] sm:$0xff] (!%p2390_p3)  ;;  %v803_v22 = vld [vmem:[#allocation2 + $0xa0] sm:$0xff] (!%p2390_p3)  ;;  %2803 = vmatprep.subr.bf16.mxu1 (!%p2390_p3), %v2407_v12  ;;  %s4809_s29 = sld [smem:[#allocation24_spill]] (!%p2390_p3) }
 0x202   : > { %2499 = vmatprep.subr.bf16.mxu0 (!%p2390_p3), %v823_v14  ;;  %v804_v23 = vld [vmem:[#allocation2 + $0xa8] sm:$0xff] (!%p2390_p3)  ;;  %2804 = vmatpush3.bf16.msra.mxu1 (!%p2390_p3), %v2407_v12  ;;  %v816_v24 = vpack.c.bf16 (!%p2390_p3), %v786_v21, %v785_v20  ;;  %v787_v27 = vld [vmem:[#allocation2 + $0x20] sm:$0xff] (!%p2390_p3)  ;;  %v805_v29 = vld [vmem:[#allocation2 + $0xb0] sm:$0xff] (!%p2390_p3) }
 0x203   : > { %2500 = vmatpush3.bf16.msra.mxu0 (!%p2390_p3), %v815_v18  ;;  %2805 = vmatprep.subr.bf16.mxu1 (!%p2390_p3), %v2408_v13  ;;  %v825_v26 = vpack.c.bf16 (!%p2390_p3), %v804_v23, %v803_v22  ;;  %v788_v28 = vld [vmem:[#allocation2 + $0x28] sm:$0xff] (!%p2390_p3)  ;;  %v806_v30 = vld [vmem:[#allocation2 + $0xb8] sm:$0xff] (!%p2390_p3)  ;;  %v789_v33 = vld [vmem:[#allocation2 + $0x30] sm:$0xff] (!%p2390_p3) }
 0x204   : > { %2501 = vmatprep.subr.bf16.mxu0 (!%p2390_p3), %v824_v19  ;;  %v817_v31 = vpack.c.bf16 (!%p2390_p3), %v788_v28, %v787_v27  ;;  %v826_v32 = vpack.c.bf16 (!%p2390_p3), %v806_v30, %v805_v29  ;;  %v790_v34 = vld [vmem:[#allocation2 + $0x38] sm:$0xff] (!%p2390_p3)  ;;  %v807_v35 = vld [vmem:[#allocation2 + $0xc0] sm:$0xff] (!%p2390_p3)  ;;  %v808_v36 = vld [vmem:[#allocation2 + $0xc8] sm:$0xff] (!%p2390_p3)  ;;  %v2410_v28 = vcombine.low (!%p2390_p3), %v4053_v63, %v4056_v0  ;;  %v2411_v29 = vcombine.low (!%p2390_p3), %v4059_v1, %v4062_v2 }
 0x205   : > { %v3270_v37 = vld [vmem:[%s3972_s8 + $0x4] ss:$8 sps:$4 sm:$0xff] (!%p2390_p3)   ;;  %v818_v38 = vpack.c.bf16 (!%p2390_p3), %v790_v34, %v789_v33  ;;  %v827_v40 = vpack.c.bf16 (!%p2390_p3), %v808_v36, %v807_v35  ;;  %v809_v42 = vld [vmem:[#allocation2 + $0xd0] sm:$0xff] (!%p2390_p3)  ;;  %v810_v43 = vld [vmem:[#allocation2 + $0xd8] sm:$0xff] (!%p2390_p3)  ;;  %v2412_v30 = vcombine.low (!%p2390_p3), %v4065_v3, %v4068_v4 }
 0x206   : > { %2806 = vmatpush3.bf16.msra.mxu1 (!%p2390_p3), %v2408_v13  ;;  %v791_v39 = vld [vmem:[#allocation2 + $0x40] sm:$0xff] (!%p2390_p3)  ;;  %v792_v41 = vld [vmem:[#allocation2 + $0x48] sm:$0xff] (!%p2390_p3)  ;;  %943 = vmatprep.mubr.bf16.mxu0 (!%p2390_p3), %v3270_v37  ;;  %v793_v45 = vld [vmem:[#allocation2 + $0x50] sm:$0xff] (!%p2390_p3)  ;;  %v828_v46 = vpack.c.bf16 (!%p2390_p3), %v810_v43, %v809_v42 }
 0x207   : > { %2502 = vmatpush3.bf16.msra.mxu0 %v816_v24  ;;  %2807 = vmatprep.subr.bf16.mxu1 %v2409_v25  ;;  %v819_v44 = vpack.c.bf16 %v792_v41, %v791_v39  ;;  %v794_v47 = vld [vmem:[#allocation2 + $0x58] sm:$0xff]  ;;  %v811_v48 = vld [vmem:[#allocation2 + $0xe0] sm:$0xff]  ;;  %v812_v49 = vld [vmem:[#allocation2 + $0xe8] sm:$0xff]  ;;  %p2415_p11 = scmp.ne.s32.totalorder %s4809_s29, 3 }
 0x208   : > { %2503 = vmatprep.subr.bf16.mxu0 %v825_v26  ;;  %v820_v50 = vpack.c.bf16 %v794_v47, %v793_v45  ;;  %v829_v51 = vpack.c.bf16 %v812_v49, %v811_v48  ;;  %v795_v52 = vld [vmem:[#allocation2 + $0x60] sm:$0xff]  ;;  %v796_v53 = vld [vmem:[#allocation2 + $0x68] sm:$0xff]  ;;  %v813_v54 = vld [vmem:[#allocation2 + $0xf0] sm:$0xff]  ;;  %s4810_s27 = sld [smem:[#allocation30_spill]] (!%p2415_p11)  ;;  %s4370_s4 = scalar_lea.vmem (!%p2415_p11), [#allocation15], %s3990_s21 }
 0x209   : > { %v814_v55 = vld [vmem:[#allocation2 + $0xf8] sm:$0xff]  ;;  %v821_v57 = vpack.c.bf16 %v796_v53, %v795_v52  ;;  %v797_v10 = vld [vmem:[#allocation2 + $0x70] sm:$0xff]  ;;  %v3268_v13 = vld [vmem:[%s3972_s8] ss:$8 sps:$4 sm:$0xff]  }
 0x20a   : > { %2808 = vmatpush3.bf16.msra.mxu1 %v2409_v25  ;;  %v830_v9 = vpack.c.bf16 %v814_v55, %v813_v54  ;;  %v798_v11 = vld [vmem:[#allocation2 + $0x78] sm:$0xff]  ;;  %v3274_v16 = vld [vmem:[%s3972_s8 + $0x24] ss:$8 sps:$4 sm:$0xff]   ;;  %v3276_v17 = vld [vmem:[%s3972_s8 + $0x20] ss:$8 sps:$4 sm:$0xff]  }
 0x20b   : > { %2504 = vmatpush3.bf16.msra.mxu0 %v817_v31  ;;  %v822_v12 = vpack.c.bf16 %v798_v11, %v797_v10  ;;  %v3271_v14 = vld [vmem:[%s3972_s8 + $0x14] ss:$8 sps:$4 sm:$0xff]   ;;  %v3273_v15 = vld [vmem:[%s3972_s8 + $0x10] ss:$8 sps:$4 sm:$0xff]   ;;  %v3280_v20 = vld [vmem:[%s3972_s8 + $0x44] ss:$8 sps:$4 sm:$0xff]   ;;  %2809 = vmatprep.subr.bf16.mxu1 %v2410_v28  ;;  %v2413_v31 = vcombine.low %v4071_v5, %v4074_v6 }
 0x20c   : > { %2505 = vmatprep.subr.bf16.mxu0 %v826_v32  ;;  %v3277_v18 = vld [vmem:[%s3972_s8 + $0x34] ss:$8 sps:$4 sm:$0xff]   ;;  %v3279_v19 = vld [vmem:[%s3972_s8 + $0x30] ss:$8 sps:$4 sm:$0xff]   ;;  %v3282_v21 = vld [vmem:[%s3972_s8 + $0x40] ss:$8 sps:$4 sm:$0xff]   ;;  %v2414_v32 = vcombine.low %v4077_v7, %v4080_v8 }
 0x20d   : > { %v3283_v22 = vld [vmem:[%s3972_s8 + $0x54] ss:$8 sps:$4 sm:$0xff]   ;;  %v3285_v23 = vld [vmem:[%s3972_s8 + $0x50] ss:$8 sps:$4 sm:$0xff]   ;;  %v3286_v24 = vld [vmem:[%s3972_s8 + $0x64] ss:$8 sps:$4 sm:$0xff]  }
 0x20e   : > { %v3288_v25 = vld [vmem:[%s3972_s8 + $0x60] ss:$8 sps:$4 sm:$0xff]   ;;  %v3289_v26 = vld [vmem:[%s3972_s8 + $0x74] ss:$8 sps:$4 sm:$0xff]   ;;  %v3291_v27 = vld [vmem:[%s3972_s8 + $0x70] ss:$8 sps:$4 sm:$0xff]   ;;  %2810 = vmatpush3.bf16.msra.mxu1 %v2410_v28 }
 0x20f   : > { %2506 = vmatpush3.bf16.msra.mxu0 %v818_v38  ;;  %2811 = vmatprep.subr.bf16.mxu1 %v2411_v29  ;;  %v1025_v35 = vld [vmem:[%s4121_s28] sm:$0xff]  ;;  %v1026_v36 = vld [vmem:[%s4121_s28 + $0x8] sm:$0xff]  ;;  %v1027_v49 = vld [vmem:[%s4121_s28 + $0x10] sm:$0xff] }
 0x210   : > { %2507 = vmatprep.subr.bf16.mxu0 %v827_v40  ;;  %v1041_v42 = vmul.f32 0.1, %v1025_v35  ;;  %v1042_v43 = vmul.f32 0.1, %v1026_v36 }
 0x212   : > { %2812 = vmatpush3.bf16.msra.mxu1 %v2411_v29 }
 0x213   : > { %2508 = vmatpush3.bf16.msra.mxu0 %v819_v44  ;;  %2813 = vmatprep.subr.bf16.mxu1 %v2412_v30 }
 0x214   : > { %2509 = vmatprep.subr.bf16.mxu0 %v828_v46 }
 0x216   : > { %2814 = vmatpush3.bf16.msra.mxu1 %v2412_v30 }
 0x217   : > { %2510 = vmatpush3.bf16.msra.mxu0 %v820_v50  ;;  %2815 = vmatprep.subr.bf16.mxu1 %v2413_v31  ;;  %v1028_v50 = vld [vmem:[%s4121_s28 + $0x18] sm:$0xff] }
 0x218   : > { %2511 = vmatprep.subr.bf16.mxu0 %v829_v51  ;;  %v1044_v10 = vmul.f32 0.1, %v1028_v50 }
 0x21a   : > { %2816 = vmatpush3.bf16.msra.mxu1 %v2413_v31  ;;  %v1031_v31 = vld [vmem:[%s4121_s28 + $0x30] sm:$0xff] }
 0x21b   : > { %2512 = vmatpush3.bf16.msra.mxu0 %v821_v57  ;;  %2817 = vmatprep.subr.bf16.mxu1 %v2414_v32  ;;  %v1043_v57 = vmul.f32 0.1, %v1027_v49  ;;  %v1034_v49 = vld [vmem:[%s4121_s28 + $0x48] sm:$0xff] }
 0x21c   : > { %2513 = vmatprep.subr.bf16.mxu0 %v830_v9 }
 0x21e   : > { %2818 = vmatpush3.bf16.msra.mxu1 %v2414_v32  ;;  %v1032_v32 = vld [vmem:[%s4121_s28 + $0x38] sm:$0xff] }
 0x21f   : > { %2514 = vmatpush3.bf16.msra.mxu0 %v822_v12 }
 0x222   : > { %944 = vmatmul.mubr.bf16.vlgmr.msra.gmra.mrb[0].mxu0 %v3268_v13 }
 0x223   : > { %951 = vmatprep.mubr.bf16.mxu0 %v3271_v14 }
 0x22a   : > { %952 = vmatmul.mubr.bf16.gmra.mrb[4].mxu0 %v3273_v15 }
 0x22b   : > { %959 = vmatprep.mubr.bf16.mxu0 %v3274_v16  ;;  %v1029_v16 = vld [vmem:[%s4121_s28 + $0x20] sm:$0xff] }
 0x232   : > { %960 = vmatmul.mubr.bf16.gmra.mrb[8].mxu0 %v3276_v17  ;;  %v1030_v17 = vld [vmem:[%s4121_s28 + $0x28] sm:$0xff] }
 0x233   : > { %967 = vmatprep.mubr.bf16.mxu0 %v3277_v18 }
 0x23a   : > { %968 = vmatmul.mubr.bf16.gmra.mrb[12].mxu0 %v3279_v19 }
 0x23b   : > { %975 = vmatprep.mubr.bf16.mxu0 %v3280_v20 }
 0x242   : > { %976 = vmatmul.mubr.bf16.gmra.mrb[16].mxu0 %v3282_v21 }
 0x243   : > { %983 = vmatprep.mubr.bf16.mxu0 %v3283_v22 }
 0x24a   : > { %984 = vmatmul.mubr.bf16.gmra.mrb[20].mxu0 %v3285_v23  ;;  %v1045_v23 = vmul.f32 0.1, %v1029_v16 }
 0x24b   : > { %991 = vmatprep.mubr.bf16.mxu0 %v3286_v24 }
 0x252   : > { %992 = vmatmul.mubr.bf16.gmra.mrb[24].mxu0 %v3288_v25  ;;  %v1046_v25 = vmul.f32 0.1, %v1030_v17  ;;  %v1035_v17 = vld [vmem:[%s4121_s28 + $0x50] sm:$0xff] }
 0x253   : > { %999 = vmatprep.mubr.bf16.mxu0 %v3289_v26 }
 0x25a   : > { %1000 = vmatmul.mubr.bf16.gmra.mrb[28].mxu0 %v3291_v27 }
 0x2f5   : > { %v2515_v33 = vpop.f32.mrb[0].mxu0 }
 0x2f6   : > { %v2516_v34 = vpop.f32.mrb[1].mxu0 }
 0x2f7   : > { %v2517_v37 = vadd.f32 %v2516_v34, %v2515_v33  ;;  %v2518_v38 = vpop.f32.mrb[2].mxu0 }
 0x2f8   : > { %v2519_v39 = vpop.f32.mrb[3].mxu0 }
 0x2f9   : > { %v1008_v40 = vmul.f32 0.9, %v2517_v37  ;;  %v2520_v41 = vadd.f32 %v2519_v39, %v2518_v38  ;;  %v1047_v38 = vmul.f32 0.1, %v1031_v31 }
 0x2fb   : > { %v1009_v44 = vmul.f32 0.9, %v2520_v41  ;;  %v4125_v46 = vadd.f32 %v1041_v42, %v1008_v40  ;;  %v1048_v40 = vmul.f32 0.1, %v1032_v32 }
 0x2fd   : > { %v2521_v45 = vpop.f32.mrb[4].mxu0  ;;  %v4127_v47 = vadd.f32 %v1042_v43, %v1009_v44 }
 0x2fe   : > { %v2522_v48 = vpop.f32.mrb[5].mxu0 }
 0x2ff   : > { %v2523_v51 = vadd.f32 %v2522_v48, %v2521_v45  ;;  %v2524_v52 = vpop.f32.mrb[6].mxu0  ;;  %v1073_v53 = vpack.c.bf16 %v4127_v47, %v4125_v46  ;;  %v1033_v48 = vld [vmem:[%s4121_s28 + $0x40] sm:$0xff] }
 0x300   : > { %v2525_v54 = vpop.f32.mrb[7].mxu0 }
 0x301   : > { %v1010_v55 = vmul.f32 0.9, %v2523_v51  ;;  %v2526_v9 = vadd.f32 %v2525_v54, %v2524_v52  ;;  %2819 = vmatprep.mubr.bf16.mxu1 %v1073_v53 }
 0x303   : > { %v1011_v11 = vmul.f32 0.9, %v2526_v9  ;;  %v4133_v12 = vadd.f32 %v1043_v57, %v1010_v55  ;;  %v1049_v55 = vmul.f32 0.1, %v1033_v48  ;;  %v1050_v9 = vmul.f32 0.1, %v1034_v49 }
 0x305   : > { %v4135_v13 = vadd.f32 %v1044_v10, %v1011_v11  ;;  %v2527_v14 = vpop.f32.mrb[8].mxu0 }
 0x306   : > { %v2528_v15 = vpop.f32.mrb[9].mxu0 }
 0x307   : > { %v2529_v18 = vadd.f32 %v2528_v15, %v2527_v14  ;;  %v2530_v19 = vpop.f32.mrb[10].mxu0  ;;  %v1074_v20 = vpack.c.bf16 %v4135_v13, %v4133_v12 }
 0x308   : > { %v2531_v21 = vpop.f32.mrb[11].mxu0 }
 0x309   : > { %v1012_v22 = vmul.f32 0.9, %v2529_v18  ;;  %v2532_v24 = vadd.f32 %v2531_v21, %v2530_v19  ;;  %2820 = vmatmul.mubr.bf16.vlgmr.msra.gmra.mrb[0].mxu1 %v1074_v20  ;;  %v1036_v18 = vld [vmem:[%s4121_s28 + $0x58] sm:$0xff] }
 0x30b   : > { %v1013_v26 = vmul.f32 0.9, %v2532_v24  ;;  %v4141_v27 = vadd.f32 %v1045_v23, %v1012_v22  ;;  %v1051_v24 = vmul.f32 0.1, %v1035_v17 }
 0x30d   : > { %v4143_v28 = vadd.f32 %v1046_v25, %v1013_v26  ;;  %v2533_v29 = vpop.f32.mrb[12].mxu0  ;;  %v1052_v26 = vmul.f32 0.1, %v1036_v18 }
 0x30e   : > { %v2534_v30 = vpop.f32.mrb[13].mxu0 }
 0x30f   : > { %v2535_v33 = vadd.f32 %v2534_v30, %v2533_v29  ;;  %v2536_v34 = vpop.f32.mrb[14].mxu0  ;;  %v1075_v35 = vpack.c.bf16 %v4143_v28, %v4141_v27 }
 0x310   : > { %v2537_v36 = vpop.f32.mrb[15].mxu0 }
 0x311   : > { %v1014_v37 = vmul.f32 0.9, %v2535_v33  ;;  %v2538_v39 = vadd.f32 %v2537_v36, %v2536_v34  ;;  %2823 = vmatprep.mubr.bf16.mxu1 %v1075_v35  ;;  %v1037_v34 = vld [vmem:[%s4121_s28 + $0x60] sm:$0xff]  ;;  %v1038_v35 = vld [vmem:[%s4121_s28 + $0x68] sm:$0xff] }
 0x313   : > { %v1015_v41 = vmul.f32 0.9, %v2538_v39  ;;  %v4149_v42 = vadd.f32 %v1047_v38, %v1014_v37 }
 0x315   : > { %v4151_v43 = vadd.f32 %v1048_v40, %v1015_v41  ;;  %v2539_v44 = vpop.f32.mrb[16].mxu0  ;;  %v1053_v41 = vmul.f32 0.1, %v1037_v34 }
 0x316   : > { %v2540_v45 = vpop.f32.mrb[17].mxu0 }
 0x317   : > { %v2541_v50 = vadd.f32 %v2540_v45, %v2539_v44  ;;  %v2542_v51 = vpop.f32.mrb[18].mxu0  ;;  %v1076_v52 = vpack.c.bf16 %v4151_v43, %v4149_v42  ;;  %v1054_v45 = vmul.f32 0.1, %v1038_v35 }
 0x318   : > { %v2543_v53 = vpop.f32.mrb[19].mxu0 }
 0x319   : > { %v1016_v54 = vmul.f32 0.9, %v2541_v50  ;;  %v2544_v57 = vadd.f32 %v2543_v53, %v2542_v51  ;;  %2824 = vmatmul.mubr.bf16.gmra.mrb[4].mxu1 %v1076_v52  ;;  %v1039_v53 = vld [vmem:[%s4121_s28 + $0x70] sm:$0xff] }
 0x31b   : > { %v1017_v10 = vmul.f32 0.9, %v2544_v57  ;;  %v4157_v11 = vadd.f32 %v1049_v55, %v1016_v54  ;;  %v1040_v54 = vld [vmem:[%s4121_s28 + $0x78] sm:$0xff] }
 0x31c   : > { %v1056_v18 = vmul.f32 0.1, %v1040_v54 }
 0x31d   : > { %v4159_v14 = vadd.f32 %v1050_v9, %v1017_v10  ;;  %v2545_v15 = vpop.f32.mrb[20].mxu0 }
 0x31e   : > { %v2546_v16 = vpop.f32.mrb[21].mxu0 }
 0x31f   : > { %v2547_v19 = vadd.f32 %v2546_v16, %v2545_v15  ;;  %v2548_v20 = vpop.f32.mrb[22].mxu0  ;;  %v1077_v21 = vpack.c.bf16 %v4159_v14, %v4157_v11  ;;  %v1055_v16 = vmul.f32 0.1, %v1039_v53 }
 0x320   : > { %v2549_v22 = vpop.f32.mrb[23].mxu0 }
 0x321   : > { %v1018_v23 = vmul.f32 0.9, %v2547_v19  ;;  %v2550_v25 = vadd.f32 %v2549_v22, %v2548_v20  ;;  %2827 = vmatprep.mubr.bf16.mxu1 %v1077_v21 }
 0x323   : > { %v1019_v29 = vmul.f32 0.9, %v2550_v25  ;;  %v4165_v30 = vadd.f32 %v1051_v24, %v1018_v23  ;;  %v4189_v23 = vstv %s4032_s10  ;;  %v4191_v24 = vstv %s1226_s1 }
 0x325   : > { %v4167_v31 = vadd.f32 %v1052_v26, %v1019_v29  ;;  %v2551_v32 = vpop.f32.mrb[24].mxu0  ;;  %v1230_v26 = vmul.f32 %v4191_v24, %v4133_v12  ;;  %v1229_v12 = vmul.f32 %v4191_v24, %v4127_v47 }
 0x326   : > { %v2552_v33 = vpop.f32.mrb[25].mxu0 }
 0x327   : > { %v2553_v36 = vadd.f32 %v2552_v33, %v2551_v32  ;;  %v2554_v37 = vpop.f32.mrb[26].mxu0  ;;  %v1078_v38 = vpack.c.bf16 %v4167_v31, %v4165_v30  ;;  %v1228_v33 = vmul.f32 %v4191_v24, %v4125_v46 }
 0x328   : > { %v2555_v39 = vpop.f32.mrb[27].mxu0 }
 0x329   : > { %v1020_v40 = vmul.f32 0.9, %v2553_v36  ;;  %v2556_v44 = vadd.f32 %v2555_v39, %v2554_v37  ;;  %2828 = vmatmul.mubr.bf16.gmra.mrb[8].mxu1 %v1078_v38  ;;  %v1231_v37 = vmul.f32 %v4191_v24, %v4135_v13 }
 0x32b   : > { %v1021_v48 = vmul.f32 0.9, %v2556_v44  ;;  %v4173_v49 = vadd.f32 %v1053_v41, %v1020_v40 }
 0x32d   : > { %v4175_v50 = vadd.f32 %v1054_v45, %v1021_v48  ;;  %v2557_v51 = vpop.f32.mrb[28].mxu0 }
 0x32e   : > { %v2558_v52 = vpop.f32.mrb[29].mxu0 }
 0x32f   : > { %v2559_v55 = vadd.f32 %v2558_v52, %v2557_v51  ;;  %v2560_v57 = vpop.f32.mrb[30].mxu0  ;;  %v1079_v9 = vpack.c.bf16 %v4175_v50, %v4173_v49  ;;  %v1234_v52 = vmul.f32 %v4191_v24, %v4149_v42 }
 0x330   : > { %v2561_v10 = vpop.f32.mrb[31].mxu0 }
 0x331   : > { %v1022_v15 = vmul.f32 0.9, %v2559_v55  ;;  %v2562_v17 = vadd.f32 %v2561_v10, %v2560_v57  ;;  %2831 = vmatprep.mubr.bf16.mxu1 %v1079_v9  ;;  %v1232_v55 = vmul.f32 %v4191_v24, %v4141_v27 }
 0x333   : > { %v1023_v19 = vmul.f32 0.9, %v2562_v17  ;;  %v4181_v20 = vadd.f32 %v1055_v16, %v1022_v15  ;;  %v1235_v15 = vmul.f32 %v4191_v24, %v4151_v43 }
 0x335   : > { %v4183_v21 = vadd.f32 %v1056_v18, %v1023_v19  ;;  %v1233_v18 = vmul.f32 %v4191_v24, %v4143_v28 }
 0x337   : > { %v1080_v22 = vpack.c.bf16 %v4183_v21, %v4181_v20 }
 0x339   : > { %2832 = vmatmul.mubr.bf16.gmra.mrb[12].mxu1 %v1080_v22 }
 0x3dc   : > { %v2821_v25 = vpop.f32.mrb[0].mxu1 }
 0x3dd   : > { %v1247_v29 = vmul.f32 %v2821_v25, %v4189_v23  ;;  %v1163_v32 = vpop.f32.mrb[1].mxu1 }
 0x3de   : > { %v1245_v34 = vmul.f32 %v4189_v23, %v1163_v32  ;;  %v2822_v35 = vpop.f32.mrb[2].mxu1  ;;  %v1238_v32 = vmul.f32 %v4191_v24, %v4165_v30 }
 0x3df   : > { %v4199_v36 = vadd.f32 %v1247_v29, %v1230_v26  ;;  %v1248_v38 = vmul.f32 %v2822_v35, %v4189_v23  ;;  %v1166_v39 = vpop.f32.mrb[3].mxu1  ;;  %v1236_v35 = vmul.f32 %v4191_v24, %v4157_v11 }
 0x3e0   : > { %v4206_v40 = vadd.f32 %v1245_v34, %v1228_v33  ;;  %v1246_v41 = vmul.f32 %v4189_v23, %v1166_v39 }
 0x3e1   : > { %v1279_v46 = vmax.f32 %v4199_v36, 0.0  ;;  %v4210_v44 = vadd.f32 %v1248_v38, %v1231_v37  ;;  %v2416_v36 = vld [vmem:[%s4810_s27] ss:$0 sm:$0xff] (!%p2415_p11) }
 0x3e2   : > { %v1277_v45 = vmax.f32 %v4206_v40, 0.0  ;;  %v4213_v48 = vadd.f32 %v1246_v41, %v1229_v12  ;;  %v1239_v12 = vmul.f32 %v4191_v24, %v4167_v31 }
 0x3e3   : > { %1296 = vst [vmem:[%s4216_s12 + $0x10] sm:$0xff] %v1279_v46  ;;  %v1280_v47 = vmax.f32 %v4210_v44, 0.0 }
 0x3e4   : > { %1294 = vst [vmem:[%s4216_s12] sm:$0xff] %v1277_v45  ;;  %v1278_v13 = vmax.f32 %v4213_v48, 0.0  ;;  %2867 = vmatprep.mubr.f32.mxu0 (!%p2415_p11), %v1277_v45  ;;  %v1322_v45 = vld [vmem:[#allocation14 + $0x40] sm:$0xff] (!%p2415_p11) }
 0x3e5   : > { %1297 = vst [vmem:[%s4216_s12 + $0x18] sm:$0xff] %v1280_v47 }
 0x3e6   : > { %1295 = vst [vmem:[%s4216_s12 + $0x8] sm:$0xff] %v1278_v13 }
 0x3ec   : > { %v2825_v51 = vpop.f32.mrb[4].mxu1 }
 0x3ed   : > { %v1251_v53 = vmul.f32 %v2825_v51, %v4189_v23  ;;  %v1179_v54 = vpop.f32.mrb[5].mxu1 }
 0x3ee   : > { %v1249_v57 = vmul.f32 %v4189_v23, %v1179_v54  ;;  %v2826_v9 = vpop.f32.mrb[6].mxu1 }
 0x3ef   : > { %v4238_v10 = vadd.f32 %v1251_v53, %v1234_v52  ;;  %v1252_v42 = vmul.f32 %v2826_v9, %v4189_v23  ;;  %v1182_v16 = vpop.f32.mrb[7].mxu1  ;;  %v1237_v52 = vmul.f32 %v4191_v24, %v4159_v14 }
 0x3f0   : > { %v4243_v17 = vadd.f32 %v1249_v57, %v1232_v55  ;;  %v1250_v27 = vmul.f32 %v4189_v23, %v1182_v16 }
 0x3f1   : > { %v1283_v19 = vmax.f32 %v4238_v10, 0.0  ;;  %v4249_v22 = vadd.f32 %v1252_v42, %v1235_v15  ;;  %v1242_v15 = vmul.f32 %v4191_v24, %v4181_v20 }
 0x3f2   : > { %v1281_v25 = vmax.f32 %v4243_v17, 0.0  ;;  %v4252_v26 = vadd.f32 %v1250_v27, %v1233_v18  ;;  %v1240_v18 = vmul.f32 %v4191_v24, %v4173_v49 }
 0x3f3   : > { %1300 = vst [vmem:[%s4216_s12 + $0x30] sm:$0xff] %v1283_v19  ;;  %v1284_v43 = vmax.f32 %v4249_v22, 0.0 }
 0x3f4   : > { %1298 = vst [vmem:[%s4216_s12 + $0x20] sm:$0xff] %v1281_v25  ;;  %v1282_v28 = vmax.f32 %v4252_v26, 0.0 }
 0x3f5   : > { %1301 = vst [vmem:[%s4216_s12 + $0x38] sm:$0xff] %v1284_v43 }
 0x3f6   : > { %1299 = vst [vmem:[%s4216_s12 + $0x28] sm:$0xff] %v1282_v28 }
 0x3fc   : > { %v2829_v29 = vpop.f32.mrb[8].mxu1 }
 0x3fd   : > { %v1255_v33 = vmul.f32 %v2829_v29, %v4189_v23  ;;  %v1195_v34 = vpop.f32.mrb[9].mxu1 }
 0x3fe   : > { %v1253_v37 = vmul.f32 %v4189_v23, %v1195_v34  ;;  %v2830_v38 = vpop.f32.mrb[10].mxu1 }
 0x3ff   : > { %v4274_v39 = vadd.f32 %v1255_v33, %v1238_v32  ;;  %v1256_v30 = vmul.f32 %v2830_v38, %v4189_v23  ;;  %v1198_v41 = vpop.f32.mrb[11].mxu1  ;;  %v1243_v33 = vmul.f32 %v4191_v24, %v4183_v21 }
 0x400   : > { %v1269_v51 = vadd.f32 %v1253_v37, %v1236_v35  ;;  %v1254_v11 = vmul.f32 %v4189_v23, %v1198_v41  ;;  %v1241_v37 = vmul.f32 %v4191_v24, %v4175_v50  ;;  %v1315_v24 = vld [vmem:[#allocation14 + $0x8] sm:$0xff] (!%p2415_p11) }
 0x401   : > { %v1287_v53 = vmax.f32 %v4274_v39, 0.0  ;;  %v4283_v54 = vadd.f32 %v1256_v30, %v1239_v12 }
 0x402   : > { %v1285_v55 = vmax.f32 %v1269_v51, 0.0  ;;  %v4285_v57 = vadd.f32 %v1254_v11, %v1237_v52  ;;  %v1316_v51 = vld [vmem:[#allocation14 + $0x10] sm:$0xff] (!%p2415_p11)  ;;  %v1317_v11 = vld [vmem:[#allocation14 + $0x18] sm:$0xff] (!%p2415_p11) }
 0x403   : > { %1304 = vst [vmem:[%s4216_s12 + $0x50] sm:$0xff] %v1287_v53  ;;  %v1288_v31 = vmax.f32 %v4283_v54, 0.0 }
 0x404   : > { %1302 = vst [vmem:[%s4216_s12 + $0x40] sm:$0xff] %v1285_v55  ;;  %v1286_v9 = vmax.f32 %v4285_v57, 0.0  ;;  %2879 = vmatprep.mubr.f32.mxu1 (!%p2415_p11), %v1285_v55  ;;  %v1323_v55 = vld [vmem:[#allocation14 + $0x48] sm:$0xff] (!%p2415_p11) }
 0x405   : > { %1305 = vst [vmem:[%s4216_s12 + $0x58] sm:$0xff] %v1288_v31 }
 0x406   : > { %1303 = vst [vmem:[%s4216_s12 + $0x48] sm:$0xff] %v1286_v9 }
 0x40c   : > { %v2833_v14 = vpop.f32.mrb[12].mxu1 }
 0x40d   : > { %v1259_v42 = vmul.f32 %v2833_v14, %v4189_v23  ;;  %v1211_v16 = vpop.f32.mrb[13].mxu1  ;;  %v3015_v14 = vpack.c.bf16 (!%p2415_p11), %v1317_v11, %v1316_v51  ;;  %v1329_v51 = vld [vmem:[#allocation14 + $0x78] sm:$0xff] (!%p2415_p11) }
 0x40e   : > { %v1257_v27 = vmul.f32 %v4189_v23, %v1211_v16  ;;  %v2834_v29 = vpop.f32.mrb[14].mxu1 }
 0x40f   : > { %v4305_v32 = vadd.f32 %v1259_v42, %v1242_v15  ;;  %v1260_v20 = vmul.f32 %v2834_v29, %v4189_v23  ;;  %v1214_v34 = vpop.f32.mrb[15].mxu1  ;;  %v1318_v15 = vld [vmem:[#allocation14 + $0x20] sm:$0xff] (!%p2415_p11)  ;;  %v1319_v42 = vld [vmem:[#allocation14 + $0x28] sm:$0xff] (!%p2415_p11)  ;;  %v3027_v29 = vpack.c.bf16 (!%p2415_p11), %v1323_v55, %v1322_v45 }
 0x410   : > { %v4310_v35 = vadd.f32 %v1257_v27, %v1240_v18  ;;  %v1258_v49 = vmul.f32 %v4189_v23, %v1214_v34  ;;  %1313 = sbr.rel (%p2415_p11) target bundleno = 1303 (0x517), region = 80  ;;  %v1314_v23 = vld [vmem:[#allocation14] sm:$0xff] (!%p2415_p11)  ;;  %v3019_v16 = vpack.c.bf16 (!%p2415_p11), %v1319_v42, %v1318_v15  ;;  %v1320_v18 = vld [vmem:[#allocation14 + $0x30] sm:$0xff] (!%p2415_p11)  ;;  %v1321_v27 = vld [vmem:[#allocation14 + $0x38] sm:$0xff] (!%p2415_p11) }
 0x411   : > { %v1291_v38 = vmax.f32 %v4305_v32, 0.0  ;;  %v4316_v12 = vadd.f32 %v1260_v20, %v1243_v33  ;;  %v3011_v52 = vpack.c.bf16 (!%p2415_p11), %v1315_v24, %v1314_v23  ;;  %v3023_v40 = vpack.c.bf16 (!%p2415_p11), %v1321_v27, %v1320_v18  ;;  %v1324_v33 = vld [vmem:[#allocation14 + $0x50] sm:$0xff] (!%p2415_p11)  ;;  %v1325_v20 = vld [vmem:[#allocation14 + $0x58] sm:$0xff] (!%p2415_p11) }
 0x412   : > { %v1289_v30 = vmax.f32 %v4310_v35, 0.0  ;;  %v4319_v41 = vadd.f32 %v1258_v49, %v1241_v37  ;;  %v3031_v34 = vpack.c.bf16 (!%p2415_p11), %v1325_v20, %v1324_v33  ;;  %v1326_v37 = vld [vmem:[#allocation14 + $0x60] sm:$0xff] (!%p2415_p11)  ;;  %v1327_v49 = vld [vmem:[#allocation14 + $0x68] sm:$0xff] (!%p2415_p11)  ;;  %v1328_v24 = vld [vmem:[#allocation14 + $0x70] sm:$0xff] (!%p2415_p11) }
 0x413   : > { %1308 = vst [vmem:[%s4216_s12 + $0x70] sm:$0xff] %v1291_v38  ;;  %v1292_v21 = vmax.f32 %v4316_v12, 0.0  ;;  %3012 = vmatprep.subr.bf16.mxu0 (!%p2415_p11), %v3011_v52  ;;  %3091 = vmatprep.subr.bf16.mxu1 (!%p2415_p11), %v3011_v52  ;;  %v3035_v23 = vpack.c.bf16 (!%p2415_p11), %v1327_v49, %v1326_v37 }
 0x414   : > { %1306 = vst [vmem:[%s4216_s12 + $0x60] sm:$0xff] %v1289_v30  ;;  %v1290_v50 = vmax.f32 %v4319_v41, 0.0  ;;  %3014 = vmatpush3.bf16.msra.mxu0 (!%p2415_p11), %v3011_v52  ;;  %3099 = vmatpush3.bf16.msra.mxu1 (!%p2415_p11), %v3011_v52  ;;  %v3039_v52 = vpack.c.bf16 (!%p2415_p11), %v1329_v51, %v1328_v24 }
 0x415   : > { %1309 = vst [vmem:[%s4216_s12 + $0x78] sm:$0xff] %v1292_v21  ;;  %3016 = vmatprep.subr.bf16.mxu0 (!%p2415_p11), %v3015_v14  ;;  %3092 = vmatprep.subr.bf16.mxu1 (!%p2415_p11), %v3015_v14 }
 0x416   : > { %1307 = vst [vmem:[%s4216_s12 + $0x68] sm:$0xff] %v1290_v50 }
 0x418   : > { %3018 = vmatpush3.bf16.msra.mxu0 %v3015_v14  ;;  %3100 = vmatpush3.bf16.msra.mxu1 %v3015_v14 }
 0x419   : > { %3020 = vmatprep.subr.bf16.mxu0 %v3019_v16  ;;  %3093 = vmatprep.subr.bf16.mxu1 %v3019_v16 }
 0x41c   : > { %3022 = vmatpush3.bf16.msra.mxu0 %v3019_v16  ;;  %3101 = vmatpush3.bf16.msra.mxu1 %v3019_v16 }
 0x41d   : > { %3024 = vmatprep.subr.bf16.mxu0 %v3023_v40  ;;  %3094 = vmatprep.subr.bf16.mxu1 %v3023_v40 }
 0x420   : > { %3026 = vmatpush3.bf16.msra.mxu0 %v3023_v40  ;;  %3102 = vmatpush3.bf16.msra.mxu1 %v3023_v40 }
 0x421   : > { %3028 = vmatprep.subr.bf16.mxu0 %v3027_v29  ;;  %3095 = vmatprep.subr.bf16.mxu1 %v3027_v29 }
 0x424   : > { %3030 = vmatpush3.bf16.msra.mxu0 %v3027_v29  ;;  %3103 = vmatpush3.bf16.msra.mxu1 %v3027_v29 }
 0x425   : > { %3032 = vmatprep.subr.bf16.mxu0 %v3031_v34  ;;  %3096 = vmatprep.subr.bf16.mxu1 %v3031_v34 }
 0x428   : > { %3034 = vmatpush3.bf16.msra.mxu0 %v3031_v34  ;;  %3104 = vmatpush3.bf16.msra.mxu1 %v3031_v34 }
 0x429   : > { %3036 = vmatprep.subr.bf16.mxu0 %v3035_v23  ;;  %3097 = vmatprep.subr.bf16.mxu1 %v3035_v23 }
 0x42c   : > { %3038 = vmatpush3.bf16.msra.mxu0 %v3035_v23  ;;  %3105 = vmatpush3.bf16.msra.mxu1 %v3035_v23 }
 0x42d   : > { %3040 = vmatprep.subr.bf16.mxu0 %v3039_v52  ;;  %3098 = vmatprep.subr.bf16.mxu1 %v3039_v52 }
 0x430   : > { %3042 = vmatpush3.bf16.msra.mxu0 %v3039_v52  ;;  %3106 = vmatpush3.bf16.msra.mxu1 %v3039_v52 }
 0x433   : > { %2868 = vmatmul.mubr.f32.vlgmr.msra.gmra.mrb[0].mxu0 %v1278_v13  ;;  %2880 = vmatmul.mubr.f32.vlgmr.msra.gmra.mrb[0].mxu1 %v1286_v9 }
 0x434   : > { %2870 = vmatprep.mubr.f32.mxu0 %v1279_v46  ;;  %2882 = vmatprep.mubr.f32.mxu1 %v1287_v53 }
 0x437   : > { %2871 = vmatmul.mubr.f32.gmra.mrb[2].mxu0 %v1280_v47  ;;  %2883 = vmatmul.mubr.f32.gmra.mrb[2].mxu1 %v1288_v31 }
 0x438   : > { %2873 = vmatprep.mubr.f32.mxu0 %v1281_v25  ;;  %2885 = vmatprep.mubr.f32.mxu1 %v1289_v30 }
 0x43b   : > { %2874 = vmatmul.mubr.f32.gmra.mrb[4].mxu0 %v1282_v28  ;;  %2886 = vmatmul.mubr.f32.gmra.mrb[4].mxu1 %v1290_v50 }
 0x43c   : > { %2876 = vmatprep.mubr.f32.mxu0 %v1283_v19  ;;  %2888 = vmatprep.mubr.f32.mxu1 %v1291_v38 }
 0x43f   : > { %2877 = vmatmul.mubr.f32.gmra.mrb[6].mxu0 %v1284_v43  ;;  %2889 = vmatmul.mubr.f32.gmra.mrb[6].mxu1 %v1292_v21 }
 0x506   : > { %v2869_v46 = vpop.f32.mrb[0].mxu0  ;;  %v2881_v44 = vpop.f32.mrb[0].mxu1 }
 0x507   : > { %v1409_v48 = vadd.f32 %v2869_v46, %v2416_v36  ;;  %v1449_v47 = vadd.f32 %v2881_v44, %v2416_v36  ;;  %v1403_v13 = vpop.f32.mrb[1].mxu0  ;;  %v1443_v10 = vpop.f32.mrb[1].mxu1 }
 0x508   : > { %v1404_v17 = vadd.f32 %v2416_v36, %v1403_v13  ;;  %v1444_v19 = vadd.f32 %v2416_v36, %v1443_v10 }
 0x509   : > { %1484 = vst [vmem:[%s4370_s4 + $0x8] sm:$0xff] %v1409_v48  ;;  %1492 = vst [vmem:[%s4370_s4 + $0x48] sm:$0xff] %v1449_v47 }
 0x50a   : > { %1483 = vst [vmem:[%s4370_s4] sm:$0xff] %v1404_v17  ;;  %1491 = vst [vmem:[%s4370_s4 + $0x40] sm:$0xff] %v1444_v19  ;;  %v2872_v22 = vpop.f32.mrb[2].mxu0  ;;  %v2884_v25 = vpop.f32.mrb[2].mxu1 }
 0x50b   : > { %v1419_v26 = vadd.f32 %v2872_v22, %v2416_v36  ;;  %v1459_v43 = vadd.f32 %v2884_v25, %v2416_v36  ;;  %v1413_v28 = vpop.f32.mrb[3].mxu0  ;;  %v1453_v39 = vpop.f32.mrb[3].mxu1 }
 0x50c   : > { %v1414_v53 = vadd.f32 %v2416_v36, %v1413_v28  ;;  %v1454_v54 = vadd.f32 %v2416_v36, %v1453_v39 }
 0x50d   : > { %1486 = vst [vmem:[%s4370_s4 + $0x18] sm:$0xff] %v1419_v26  ;;  %1494 = vst [vmem:[%s4370_s4 + $0x58] sm:$0xff] %v1459_v43 }
 0x50e   : > { %1485 = vst [vmem:[%s4370_s4 + $0x10] sm:$0xff] %v1414_v53  ;;  %1493 = vst [vmem:[%s4370_s4 + $0x50] sm:$0xff] %v1454_v54  ;;  %v2875_v57 = vpop.f32.mrb[4].mxu0  ;;  %v2887_v31 = vpop.f32.mrb[4].mxu1 }
 0x50f   : > { %v1429_v9 = vadd.f32 %v2875_v57, %v2416_v36  ;;  %v1469_v32 = vadd.f32 %v2887_v31, %v2416_v36  ;;  %v1423_v35 = vpop.f32.mrb[5].mxu0  ;;  %v1463_v38 = vpop.f32.mrb[5].mxu1 }
 0x510   : > { %v1424_v12 = vadd.f32 %v2416_v36, %v1423_v35  ;;  %v1464_v30 = vadd.f32 %v2416_v36, %v1463_v38 }
 0x511   : > { %1488 = vst [vmem:[%s4370_s4 + $0x28] sm:$0xff] %v1429_v9  ;;  %1496 = vst [vmem:[%s4370_s4 + $0x68] sm:$0xff] %v1469_v32 }
 0x512   : > { %1487 = vst [vmem:[%s4370_s4 + $0x20] sm:$0xff] %v1424_v12  ;;  %1495 = vst [vmem:[%s4370_s4 + $0x60] sm:$0xff] %v1464_v30  ;;  %v2878_v41 = vpop.f32.mrb[6].mxu0  ;;  %v2890_v21 = vpop.f32.mrb[6].mxu1 }
 0x513   : > { %v1439_v50 = vadd.f32 %v2878_v41, %v2416_v36  ;;  %v1479_v11 = vadd.f32 %v2890_v21, %v2416_v36  ;;  %v1433_v14 = vpop.f32.mrb[7].mxu0  ;;  %v1473_v15 = vpop.f32.mrb[7].mxu1 }
 0x514   : > { %v1434_v42 = vadd.f32 %v2416_v36, %v1433_v14  ;;  %v1474_v16 = vadd.f32 %v2416_v36, %v1473_v15 }
 0x515   : > { %1490 = vst [vmem:[%s4370_s4 + $0x38] sm:$0xff] %v1439_v50  ;;  %1498 = vst [vmem:[%s4370_s4 + $0x78] sm:$0xff] %v1479_v11 }
 0x516   : > { %1489 = vst [vmem:[%s4370_s4 + $0x30] sm:$0xff] %v1434_v42  ;;  %1497 = vst [vmem:[%s4370_s4 + $0x70] sm:$0xff] %v1474_v16 }
 0x517 PF: > { %p2417_p0 = scmp.ne.s32.totalorder %s4834_s15, 1 }
 0x518   : > { %v2434_v45 = vcombine.low (!%p2417_p0), %v4035_v56, %v4038_v58  ;;  %v2435_v55 = vcombine.low (!%p2417_p0), %v4041_v59, %v4044_v60  ;;  %v2436_v56 = vcombine.low (!%p2417_p0), %v4047_v61, %v4050_v62  ;;  %v3294_v22 = vld [vmem:[%s3972_s8 + $0x4] ss:$8 sps:$4 sm:$0xff] (!%p2417_p0)   ;;  %v3292_v42 = vld [vmem:[%s3972_s8] ss:$8 sps:$4 sm:$0xff] (!%p2417_p0)   ;;  %v3295_v16 = vld [vmem:[%s3972_s8 + $0x14] ss:$8 sps:$4 sm:$0xff] (!%p2417_p0)  }
 0x519   : > { %1502 = sbr.rel (%p2417_p0) target bundleno = 2101 (0x835), region = 84  ;;  %1679 = vmatprep.mubr.bf16.mxu0 (!%p2417_p0), %v3294_v22  ;;  %s1962_s30 = ssub.f32 (!%p2417_p0), 1.0, %s4032_s10 }
 0x51a   : > { %2891 = vmatprep.subr.bf16.mxu1 (!%p2417_p0), %v2434_v45  ;;  %s4517_s14 = scalar_lea.vmem (!%p2417_p0), [#allocation2], %s3990_s21 }
 0x51b   : > { %2892 = vmatpush3.bf16.msra.mxu1 (!%p2417_p0), %v2434_v45  ;;  %v3301_v45 = vld [vmem:[%s3972_s8 + $0x34] ss:$8 sps:$4 sm:$0xff] (!%p2417_p0)  }
 0x51c   : > { %2893 = vmatprep.subr.bf16.mxu1 (!%p2417_p0), %v2435_v55 }
 0x51d   : > { %v1535_v18 = vld [vmem:[#allocation3 + $0x80] sm:$0xff] (!%p2417_p0)  ;;  %v1536_v27 = vld [vmem:[#allocation3 + $0x88] sm:$0xff] (!%p2417_p0)  ;;  %v1537_v20 = vld [vmem:[#allocation3 + $0x90] sm:$0xff] (!%p2417_p0) }
 0x51e   : > { %v1519_v40 = vld [vmem:[#allocation3] sm:$0xff] (!%p2417_p0)  ;;  %v1559_v29 = vpack.c.bf16 (!%p2417_p0), %v1536_v27, %v1535_v18  ;;  %v1520_v33 = vld [vmem:[#allocation3 + $0x8] sm:$0xff] (!%p2417_p0)  ;;  %v1538_v34 = vld [vmem:[#allocation3 + $0x98] sm:$0xff] (!%p2417_p0) }
 0x51f   : > { %v1551_v37 = vpack.c.bf16 (!%p2417_p0), %v1520_v33, %v1519_v40  ;;  %v1560_v49 = vpack.c.bf16 (!%p2417_p0), %v1538_v34, %v1537_v20  ;;  %v1521_v23 = vld [vmem:[#allocation3 + $0x10] sm:$0xff] (!%p2417_p0)  ;;  %v1522_v24 = vld [vmem:[#allocation3 + $0x18] sm:$0xff] (!%p2417_p0)  ;;  %v1539_v51 = vld [vmem:[#allocation3 + $0xa0] sm:$0xff] (!%p2417_p0)  ;;  %2894 = vmatpush3.bf16.msra.mxu1 (!%p2417_p0), %v2435_v55 }
 0x520   : > { %2611 = vmatprep.subr.bf16.mxu0 %v1559_v29  ;;  %v1540_v52 = vld [vmem:[#allocation3 + $0xa8] sm:$0xff]  ;;  %v1552_v36 = vpack.c.bf16 %v1522_v24, %v1521_v23  ;;  %v1523_v59 = vld [vmem:[#allocation3 + $0x20] sm:$0xff]  ;;  %v1541_v46 = vld [vmem:[#allocation3 + $0xb0] sm:$0xff]  ;;  %2895 = vmatprep.subr.bf16.mxu1 %v2436_v56 }
 0x521   : > { %2612 = vmatpush3.bf16.msra.mxu0 %v1551_v37  ;;  %v1561_v58 = vpack.c.bf16 %v1540_v52, %v1539_v51  ;;  %v1524_v60 = vld [vmem:[#allocation3 + $0x28] sm:$0xff]  ;;  %v1542_v44 = vld [vmem:[#allocation3 + $0xb8] sm:$0xff]  ;;  %v1525_v13 = vld [vmem:[#allocation3 + $0x30] sm:$0xff]  ;;  %v2437_v51 = vcombine.low %v4053_v63, %v4056_v0  ;;  %v2438_v52 = vcombine.low %v4059_v1, %v4062_v2  ;;  %v2441_v63 = vcombine.low %v4077_v7, %v4080_v8 }
 0x522   : > { %2613 = vmatprep.subr.bf16.mxu0 %v1560_v49  ;;  %v1553_v48 = vpack.c.bf16 %v1524_v60, %v1523_v59  ;;  %v1562_v47 = vpack.c.bf16 %v1542_v44, %v1541_v46  ;;  %v1526_v10 = vld [vmem:[#allocation3 + $0x38] sm:$0xff]  ;;  %v1543_v17 = vld [vmem:[#allocation3 + $0xc0] sm:$0xff]  ;;  %v1544_v19 = vld [vmem:[#allocation3 + $0xc8] sm:$0xff] }
 0x523   : > { %2896 = vmatpush3.bf16.msra.mxu1 %v2436_v56  ;;  %v1554_v61 = vpack.c.bf16 %v1526_v10, %v1525_v13  ;;  %v1527_v62 = vld [vmem:[#allocation3 + $0x40] sm:$0xff]  ;;  %v1563_v25 = vpack.c.bf16 %v1544_v19, %v1543_v17  ;;  %v1528_v26 = vld [vmem:[#allocation3 + $0x48] sm:$0xff]  ;;  %v1545_v43 = vld [vmem:[#allocation3 + $0xd0] sm:$0xff]  ;;  %v2440_v56 = vcombine.low %v4071_v5, %v4074_v6 }
 0x524   : > { %v1546_v28 = vld [vmem:[#allocation3 + $0xd8] sm:$0xff]  ;;  %v1555_v39 = vpack.c.bf16 %v1528_v26, %v1527_v62  ;;  %v1529_v53 = vld [vmem:[#allocation3 + $0x50] sm:$0xff]  ;;  %v1547_v31 = vld [vmem:[#allocation3 + $0xe0] sm:$0xff]  ;;  %2897 = vmatprep.subr.bf16.mxu1 %v2437_v51 }
 0x525   : > { %2614 = vmatpush3.bf16.msra.mxu0 %v1552_v36  ;;  %v1564_v54 = vpack.c.bf16 %v1546_v28, %v1545_v43  ;;  %v1530_v57 = vld [vmem:[#allocation3 + $0x58] sm:$0xff]  ;;  %v1548_v9 = vld [vmem:[#allocation3 + $0xe8] sm:$0xff]  ;;  %v1531_v38 = vld [vmem:[#allocation3 + $0x60] sm:$0xff]  ;;  %v2439_v36 = vcombine.low %v4065_v3, %v4068_v4 }
 0x526   : > { %2615 = vmatprep.subr.bf16.mxu0 %v1561_v58  ;;  %v1556_v32 = vpack.c.bf16 %v1530_v57, %v1529_v53  ;;  %v1565_v35 = vpack.c.bf16 %v1548_v9, %v1547_v31  ;;  %v1532_v12 = vld [vmem:[#allocation3 + $0x68] sm:$0xff]  ;;  %v1549_v30 = vld [vmem:[#allocation3 + $0xf0] sm:$0xff]  ;;  %v1550_v41 = vld [vmem:[#allocation3 + $0xf8] sm:$0xff] }
 0x527   : > { %v1557_v21 = vpack.c.bf16 %v1532_v12, %v1531_v38  ;;  %v1566_v50 = vpack.c.bf16 %v1550_v41, %v1549_v30  ;;  %v1533_v11 = vld [vmem:[#allocation3 + $0x70] sm:$0xff]  ;;  %v1534_v14 = vld [vmem:[#allocation3 + $0x78] sm:$0xff]  ;;  %v3298_v27 = vld [vmem:[%s3972_s8 + $0x24] ss:$8 sps:$4 sm:$0xff]   ;;  %2898 = vmatpush3.bf16.msra.mxu1 %v2437_v51 }
 0x528   : > { %v1558_v15 = vpack.c.bf16 %v1534_v14, %v1533_v11  ;;  %v3297_v18 = vld [vmem:[%s3972_s8 + $0x10] ss:$8 sps:$4 sm:$0xff]   ;;  %v3300_v40 = vld [vmem:[%s3972_s8 + $0x20] ss:$8 sps:$4 sm:$0xff]   ;;  %v3304_v29 = vld [vmem:[%s3972_s8 + $0x44] ss:$8 sps:$4 sm:$0xff]   ;;  %2899 = vmatprep.subr.bf16.mxu1 %v2438_v52 }
 0x529   : > { %2616 = vmatpush3.bf16.msra.mxu0 %v1553_v48  ;;  %v3303_v55 = vld [vmem:[%s3972_s8 + $0x30] ss:$8 sps:$4 sm:$0xff]   ;;  %v3306_v33 = vld [vmem:[%s3972_s8 + $0x40] ss:$8 sps:$4 sm:$0xff]   ;;  %v3307_v20 = vld [vmem:[%s3972_s8 + $0x54] ss:$8 sps:$4 sm:$0xff]  }
 0x52a   : > { %2617 = vmatprep.subr.bf16.mxu0 %v1562_v47  ;;  %v3309_v34 = vld [vmem:[%s3972_s8 + $0x50] ss:$8 sps:$4 sm:$0xff]   ;;  %v3310_v37 = vld [vmem:[%s3972_s8 + $0x64] ss:$8 sps:$4 sm:$0xff]   ;;  %v3312_v49 = vld [vmem:[%s3972_s8 + $0x60] ss:$8 sps:$4 sm:$0xff]  }
 0x52b   : > { %v3313_v23 = vld [vmem:[%s3972_s8 + $0x74] ss:$8 sps:$4 sm:$0xff]   ;;  %v3315_v24 = vld [vmem:[%s3972_s8 + $0x70] ss:$8 sps:$4 sm:$0xff]   ;;  %2900 = vmatpush3.bf16.msra.mxu1 %v2438_v52  ;;  %s4422_s8 = scalar_lea.vmem [#allocation4], %s3990_s21 }
 0x52c   : > { %2901 = vmatprep.subr.bf16.mxu1 %v2439_v36  ;;  %v1761_v1 = vld [vmem:[%s4422_s8] sm:$0xff]  ;;  %v1762_v2 = vld [vmem:[%s4422_s8 + $0x8] sm:$0xff]  ;;  %v1763_v13 = vld [vmem:[%s4422_s8 + $0x10] sm:$0xff] }
 0x52d   : > { %2618 = vmatpush3.bf16.msra.mxu0 %v1554_v61  ;;  %v1777_v60 = vmul.f32 0.1, %v1761_v1  ;;  %v1778_v46 = vmul.f32 0.1, %v1762_v2  ;;  %v1764_v10 = vld [vmem:[%s4422_s8 + $0x18] sm:$0xff]  ;;  %v1765_v31 = vld [vmem:[%s4422_s8 + $0x20] sm:$0xff] }
 0x52e   : > { %2619 = vmatprep.subr.bf16.mxu0 %v1563_v25  ;;  %v1779_v25 = vmul.f32 0.1, %v1763_v13  ;;  %v1780_v43 = vmul.f32 0.1, %v1764_v10  ;;  %v1766_v9 = vld [vmem:[%s4422_s8 + $0x28] sm:$0xff] }
 0x52f   : > { %2902 = vmatpush3.bf16.msra.mxu1 %v2439_v36  ;;  %v1781_v41 = vmul.f32 0.1, %v1765_v31  ;;  %v1769_v36 = vld [vmem:[%s4422_s8 + $0x40] sm:$0xff] }
 0x530   : > { %2903 = vmatprep.subr.bf16.mxu1 %v2440_v56  ;;  %v1773_v31 = vld [vmem:[%s4422_s8 + $0x60] sm:$0xff] }
 0x531   : > { %2620 = vmatpush3.bf16.msra.mxu0 %v1555_v39 }
 0x532   : > { %2621 = vmatprep.subr.bf16.mxu0 %v1564_v54 }
 0x533   : > { %2904 = vmatpush3.bf16.msra.mxu1 %v2440_v56  ;;  %v1770_v56 = vld [vmem:[%s4422_s8 + $0x48] sm:$0xff] }
 0x534   : > { %2905 = vmatprep.subr.bf16.mxu1 %v2441_v63 }
 0x535   : > { %2622 = vmatpush3.bf16.msra.mxu0 %v1556_v32 }
 0x536   : > { %2623 = vmatprep.subr.bf16.mxu0 %v1565_v35 }
 0x537   : > { %2906 = vmatpush3.bf16.msra.mxu1 %v2441_v63 }
 0x539   : > { %2624 = vmatpush3.bf16.msra.mxu0 %v1557_v21 }
 0x53a   : > { %2625 = vmatprep.subr.bf16.mxu0 %v1566_v50  ;;  %v1782_v50 = vmul.f32 0.1, %v1766_v9  ;;  %v1774_v9 = vld [vmem:[%s4422_s8 + $0x68] sm:$0xff] }
 0x53d   : > { %2626 = vmatpush3.bf16.msra.mxu0 %v1558_v15 }
 0x540   : > { %1680 = vmatmul.mubr.bf16.vlgmr.msra.gmra.mrb[0].mxu0 %v3292_v42 }
 0x541   : > { %1687 = vmatprep.mubr.bf16.mxu0 %v3295_v16 }
 0x548   : > { %1688 = vmatmul.mubr.bf16.gmra.mrb[4].mxu0 %v3297_v18  ;;  %v1767_v18 = vld [vmem:[%s4422_s8 + $0x30] sm:$0xff] }
 0x549   : > { %1695 = vmatprep.mubr.bf16.mxu0 %v3298_v27  ;;  %v1768_v27 = vld [vmem:[%s4422_s8 + $0x38] sm:$0xff] }
 0x550   : > { %1696 = vmatmul.mubr.bf16.gmra.mrb[8].mxu0 %v3300_v40 }
 0x551   : > { %1703 = vmatprep.mubr.bf16.mxu0 %v3301_v45 }
 0x558   : > { %1704 = vmatmul.mubr.bf16.gmra.mrb[12].mxu0 %v3303_v55 }
 0x559   : > { %1711 = vmatprep.mubr.bf16.mxu0 %v3304_v29 }
 0x560   : > { %1712 = vmatmul.mubr.bf16.gmra.mrb[16].mxu0 %v3306_v33 }
 0x561   : > { %1719 = vmatprep.mubr.bf16.mxu0 %v3307_v20  ;;  %v1783_v20 = vmul.f32 0.1, %v1767_v18 }
 0x568   : > { %1720 = vmatmul.mubr.bf16.gmra.mrb[20].mxu0 %v3309_v34 }
 0x569   : > { %1727 = vmatprep.mubr.bf16.mxu0 %v3310_v37  ;;  %v1784_v37 = vmul.f32 0.1, %v1768_v27 }
 0x570   : > { %1728 = vmatmul.mubr.bf16.gmra.mrb[24].mxu0 %v3312_v49 }
 0x571   : > { %1735 = vmatprep.mubr.bf16.mxu0 %v3313_v23 }
 0x578   : > { %1736 = vmatmul.mubr.bf16.gmra.mrb[28].mxu0 %v3315_v24 }
 0x613   : > { %v2627_v0 = vpop.f32.mrb[0].mxu0 }
 0x614   : > { %v2628_v58 = vpop.f32.mrb[1].mxu0 }
 0x615   : > { %v2629_v3 = vadd.f32 %v2628_v58, %v2627_v0  ;;  %v2630_v4 = vpop.f32.mrb[2].mxu0 }
 0x616   : > { %v2631_v5 = vpop.f32.mrb[3].mxu0 }
 0x617   : > { %v1744_v6 = vmul.f32 0.9, %v2629_v3  ;;  %v2632_v59 = vadd.f32 %v2631_v5, %v2630_v4  ;;  %v1785_v3 = vmul.f32 0.1, %v1769_v36  ;;  %v1786_v5 = vmul.f32 0.1, %v1770_v56 }
 0x619   : > { %v1745_v7 = vmul.f32 0.9, %v2632_v59  ;;  %v4426_v44 = vadd.f32 %v1777_v60, %v1744_v6 }
 0x61b   : > { %v2633_v8 = vpop.f32.mrb[4].mxu0  ;;  %v4428_v48 = vadd.f32 %v1778_v46, %v1745_v7 }
 0x61c   : > { %v2634_v47 = vpop.f32.mrb[5].mxu0 }
 0x61d   : > { %v2635_v17 = vadd.f32 %v2634_v47, %v2633_v8  ;;  %v2636_v19 = vpop.f32.mrb[6].mxu0  ;;  %v1809_v22 = vpack.c.bf16 %v4428_v48, %v4426_v44  ;;  %v1771_v8 = vld [vmem:[%s4422_s8 + $0x50] sm:$0xff]  ;;  %v1772_v47 = vld [vmem:[%s4422_s8 + $0x58] sm:$0xff] }
 0x61e   : > { %v2637_v61 = vpop.f32.mrb[7].mxu0 }
 0x61f   : > { %v1746_v62 = vmul.f32 0.9, %v2635_v17  ;;  %v2638_v26 = vadd.f32 %v2637_v61, %v2636_v19  ;;  %2907 = vmatprep.mubr.bf16.mxu1 %v1809_v22  ;;  %v1787_v61 = vmul.f32 0.1, %v1771_v8 }
 0x621   : > { %v1747_v28 = vmul.f32 0.9, %v2638_v26  ;;  %v4434_v39 = vadd.f32 %v1779_v25, %v1746_v62  ;;  %v1788_v25 = vmul.f32 0.1, %v1772_v47 }
 0x623   : > { %v4436_v53 = vadd.f32 %v1780_v43, %v1747_v28  ;;  %v2639_v54 = vpop.f32.mrb[8].mxu0 }
 0x624   : > { %v2640_v57 = vpop.f32.mrb[9].mxu0 }
 0x625   : > { %v2641_v32 = vadd.f32 %v2640_v57, %v2639_v54  ;;  %v2642_v35 = vpop.f32.mrb[10].mxu0  ;;  %v1810_v38 = vpack.c.bf16 %v4436_v53, %v4434_v39 }
 0x626   : > { %v2643_v12 = vpop.f32.mrb[11].mxu0 }
 0x627   : > { %v1748_v30 = vmul.f32 0.9, %v2641_v32  ;;  %v2644_v21 = vadd.f32 %v2643_v12, %v2642_v35  ;;  %2908 = vmatmul.mubr.bf16.vlgmr.msra.gmra.mrb[0].mxu1 %v1810_v38 }
 0x629   : > { %v1749_v11 = vmul.f32 0.9, %v2644_v21  ;;  %v4442_v14 = vadd.f32 %v1781_v41, %v1748_v30  ;;  %v1789_v41 = vmul.f32 0.1, %v1773_v31 }
 0x62b   : > { %v4444_v15 = vadd.f32 %v1782_v50, %v1749_v11  ;;  %v2645_v42 = vpop.f32.mrb[12].mxu0  ;;  %v1790_v50 = vmul.f32 0.1, %v1774_v9 }
 0x62c   : > { %v2646_v16 = vpop.f32.mrb[13].mxu0 }
 0x62d   : > { %v2647_v40 = vadd.f32 %v2646_v16, %v2645_v42  ;;  %v2648_v45 = vpop.f32.mrb[14].mxu0  ;;  %v1811_v55 = vpack.c.bf16 %v4444_v15, %v4442_v14 }
 0x62e   : > { %v2649_v29 = vpop.f32.mrb[15].mxu0 }
 0x62f   : > { %v1750_v33 = vmul.f32 0.9, %v2647_v40  ;;  %v2650_v34 = vadd.f32 %v2649_v29, %v2648_v45  ;;  %2911 = vmatprep.mubr.bf16.mxu1 %v1811_v55  ;;  %v1775_v40 = vld [vmem:[%s4422_s8 + $0x70] sm:$0xff]  ;;  %v1776_v45 = vld [vmem:[%s4422_s8 + $0x78] sm:$0xff] }
 0x631   : > { %v1751_v49 = vmul.f32 0.9, %v2650_v34  ;;  %v4450_v23 = vadd.f32 %v1783_v20, %v1750_v33 }
 0x633   : > { %v4452_v24 = vadd.f32 %v1784_v37, %v1751_v49  ;;  %v2651_v51 = vpop.f32.mrb[16].mxu0  ;;  %v1791_v37 = vmul.f32 0.1, %v1775_v40 }
 0x634   : > { %v2652_v52 = vpop.f32.mrb[17].mxu0 }
 0x635   : > { %v2653_v63 = vadd.f32 %v2652_v52, %v2651_v51  ;;  %v2654_v0 = vpop.f32.mrb[18].mxu0  ;;  %v1812_v58 = vpack.c.bf16 %v4452_v24, %v4450_v23  ;;  %v1792_v51 = vmul.f32 0.1, %v1776_v45 }
 0x636   : > { %v2655_v1 = vpop.f32.mrb[19].mxu0 }
 0x637   : > { %v1752_v2 = vmul.f32 0.9, %v2653_v63  ;;  %v2656_v4 = vadd.f32 %v2655_v1, %v2654_v0  ;;  %2912 = vmatmul.mubr.bf16.gmra.mrb[4].mxu1 %v1812_v58  ;;  %v4490_v0 = vstv %s4032_s10  ;;  %v4492_v58 = vstv %s1962_s30  ;;  %s4811_s10 = sld [smem:[#allocation24_spill]] }
 0x638   : > { %v1967_v8 = vmul.f32 %v4492_v58, %v4436_v53 }
 0x639   : > { %v1753_v6 = vmul.f32 0.9, %v2656_v4  ;;  %v4458_v59 = vadd.f32 %v1785_v3, %v1752_v2  ;;  %v1966_v2 = vmul.f32 %v4492_v58, %v4434_v39  ;;  %v1965_v39 = vmul.f32 %v4492_v58, %v4428_v48 }
 0x63b   : > { %v4460_v60 = vadd.f32 %v1786_v5, %v1753_v6  ;;  %v2657_v46 = vpop.f32.mrb[20].mxu0  ;;  %v1964_v5 = vmul.f32 %v4492_v58, %v4426_v44 }
 0x63c   : > { %v2658_v7 = vpop.f32.mrb[21].mxu0 }
 0x63d   : > { %v2659_v13 = vadd.f32 %v2658_v7, %v2657_v46  ;;  %v2660_v10 = vpop.f32.mrb[22].mxu0  ;;  %v1813_v17 = vpack.c.bf16 %v4460_v60, %v4458_v59  ;;  %p2442_p12 = scmp.ne.s32.totalorder %s4811_s10, 3 }
 0x63e   : > { %v2661_v19 = vpop.f32.mrb[23].mxu0  ;;  %s4812_s13 = sld [smem:[#allocation30_spill]] (!%p2442_p12)  ;;  %s4671_s11 = scalar_lea.vmem (!%p2442_p12), [#allocation15], %s3990_s21 }
 0x63f   : > { %v1754_v22 = vmul.f32 0.9, %v2659_v13  ;;  %v2662_v62 = vadd.f32 %v2661_v19, %v2660_v10  ;;  %2915 = vmatprep.mubr.bf16.mxu1 %v1813_v17 }
 0x641   : > { %v1755_v26 = vmul.f32 0.9, %v2662_v62  ;;  %v4466_v43 = vadd.f32 %v1787_v61, %v1754_v22 }
 0x643   : > { %v4468_v28 = vadd.f32 %v1788_v25, %v1755_v26  ;;  %v2663_v54 = vpop.f32.mrb[24].mxu0  ;;  %v1970_v25 = vmul.f32 %v4492_v58, %v4450_v23 }
 0x644   : > { %v2664_v57 = vpop.f32.mrb[25].mxu0 }
 0x645   : > { %v2665_v32 = vadd.f32 %v2664_v57, %v2663_v54  ;;  %v2666_v35 = vpop.f32.mrb[26].mxu0  ;;  %v1814_v38 = vpack.c.bf16 %v4468_v28, %v4466_v43  ;;  %v1968_v57 = vmul.f32 %v4492_v58, %v4442_v14 }
 0x646   : > { %v2667_v12 = vpop.f32.mrb[27].mxu0 }
 0x647   : > { %v1756_v30 = vmul.f32 0.9, %v2665_v32  ;;  %v2668_v21 = vadd.f32 %v2667_v12, %v2666_v35  ;;  %2916 = vmatmul.mubr.bf16.gmra.mrb[8].mxu1 %v1814_v38  ;;  %v1971_v35 = vmul.f32 %v4492_v58, %v4452_v24 }
 0x649   : > { %v1757_v11 = vmul.f32 0.9, %v2668_v21  ;;  %v4474_v42 = vadd.f32 %v1789_v41, %v1756_v30  ;;  %v1969_v30 = vmul.f32 %v4492_v58, %v4444_v15 }
 0x64b   : > { %v4476_v16 = vadd.f32 %v1790_v50, %v1757_v11  ;;  %v2669_v18 = vpop.f32.mrb[28].mxu0 }
 0x64c   : > { %v2670_v27 = vpop.f32.mrb[29].mxu0 }
 0x64d   : > { %v2671_v55 = vadd.f32 %v2670_v27, %v2669_v18  ;;  %v2672_v29 = vpop.f32.mrb[30].mxu0  ;;  %v1815_v33 = vpack.c.bf16 %v4476_v16, %v4474_v42  ;;  %v1974_v27 = vmul.f32 %v4492_v58, %v4466_v43 }
 0x64e   : > { %v2673_v20 = vpop.f32.mrb[31].mxu0 }
 0x64f   : > { %v1758_v34 = vmul.f32 0.9, %v2671_v55  ;;  %v2674_v49 = vadd.f32 %v2673_v20, %v2672_v29  ;;  %2919 = vmatprep.mubr.bf16.mxu1 %v1815_v33  ;;  %v1972_v55 = vmul.f32 %v4492_v58, %v4458_v59 }
 0x651   : > { %v1759_v52 = vmul.f32 0.9, %v2674_v49  ;;  %v4482_v36 = vadd.f32 %v1791_v37, %v1758_v34  ;;  %v1975_v34 = vmul.f32 %v4492_v58, %v4468_v28 }
 0x653   : > { %v4484_v56 = vadd.f32 %v1792_v51, %v1759_v52  ;;  %v1973_v51 = vmul.f32 %v4492_v58, %v4460_v60 }
 0x655   : > { %v1816_v63 = vpack.c.bf16 %v4484_v56, %v4482_v36 }
 0x657   : > { %2920 = vmatmul.mubr.bf16.gmra.mrb[12].mxu1 %v1816_v63 }
 0x6fa   : > { %v2909_v1 = vpop.f32.mrb[0].mxu1 }
 0x6fb   : > { %v1983_v3 = vmul.f32 %v2909_v1, %v4490_v0  ;;  %v1899_v4 = vpop.f32.mrb[1].mxu1 }
 0x6fc   : > { %v1981_v6 = vmul.f32 %v4490_v0, %v1899_v4  ;;  %v2910_v46 = vpop.f32.mrb[2].mxu1  ;;  %v1978_v4 = vmul.f32 %v4492_v58, %v4482_v36 }
 0x6fd   : > { %v4500_v7 = vadd.f32 %v1983_v3, %v1966_v2  ;;  %v1984_v47 = vmul.f32 %v2910_v46, %v4490_v0  ;;  %v1902_v13 = vpop.f32.mrb[3].mxu1  ;;  %v1976_v46 = vmul.f32 %v4492_v58, %v4474_v42 }
 0x6fe   : > { %v4507_v10 = vadd.f32 %v1981_v6, %v1964_v5  ;;  %v1982_v17 = vmul.f32 %v4490_v0, %v1902_v13 }
 0x6ff   : > { %v2015_v44 = vmax.f32 %v4500_v7, 0.0  ;;  %v4511_v19 = vadd.f32 %v1984_v47, %v1967_v8  ;;  %v2443_v7 = vld [vmem:[%s4812_s13] ss:$0 sm:$0xff] (!%p2442_p12) }
 0x700   : > { %v2013_v22 = vmax.f32 %v4507_v10, 0.0  ;;  %v4514_v61 = vadd.f32 %v1982_v17, %v1965_v39  ;;  %v1979_v39 = vmul.f32 %v4492_v58, %v4484_v56 }
 0x701   : > { %2032 = vst [vmem:[%s4517_s14 + $0x10] sm:$0xff] %v2015_v44  ;;  %v2016_v48 = vmax.f32 %v4511_v19, 0.0 }
 0x702   : > { %2030 = vst [vmem:[%s4517_s14] sm:$0xff] %v2013_v22  ;;  %v2014_v53 = vmax.f32 %v4514_v61, 0.0  ;;  %2955 = vmatprep.mubr.f32.mxu0 (!%p2442_p12), %v2013_v22  ;;  %v2058_v22 = vld [vmem:[#allocation14 + $0x40] sm:$0xff] (!%p2442_p12) }
 0x703   : > { %2033 = vst [vmem:[%s4517_s14 + $0x18] sm:$0xff] %v2016_v48 }
 0x704   : > { %2031 = vst [vmem:[%s4517_s14 + $0x8] sm:$0xff] %v2014_v53 }
 0x70a   : > { %v2913_v62 = vpop.f32.mrb[4].mxu1 }
 0x70b   : > { %v1987_v26 = vmul.f32 %v2913_v62, %v4490_v0  ;;  %v1915_v54 = vpop.f32.mrb[5].mxu1 }
 0x70c   : > { %v1985_v31 = vmul.f32 %v4490_v0, %v1915_v54  ;;  %v2914_v9 = vpop.f32.mrb[6].mxu1 }
 0x70d   : > { %v4539_v32 = vadd.f32 %v1987_v26, %v1970_v25  ;;  %v1988_v23 = vmul.f32 %v2914_v9, %v4490_v0  ;;  %v1918_v38 = vpop.f32.mrb[7].mxu1  ;;  %v1977_v25 = vmul.f32 %v4492_v58, %v4476_v16  ;;  %v2051_v58 = vld [vmem:[#allocation14 + $0x8] sm:$0xff] (!%p2442_p12)  ;;  %v2052_v9 = vld [vmem:[#allocation14 + $0x10] sm:$0xff] (!%p2442_p12) }
 0x70e   : > { %v4544_v12 = vadd.f32 %v1985_v31, %v1968_v57  ;;  %v1986_v14 = vmul.f32 %v4490_v0, %v1918_v38 }
 0x70f   : > { %v2019_v41 = vmax.f32 %v4539_v32, 0.0  ;;  %v4550_v21 = vadd.f32 %v1988_v23, %v1971_v35  ;;  %v2053_v23 = vld [vmem:[#allocation14 + $0x18] sm:$0xff] (!%p2442_p12) }
 0x710   : > { %v2017_v50 = vmax.f32 %v4544_v12, 0.0  ;;  %v4553_v11 = vadd.f32 %v1986_v14, %v1969_v30  ;;  %v3047_v38 = vpack.c.bf16 (!%p2442_p12), %v2053_v23, %v2052_v9  ;;  %v2054_v30 = vld [vmem:[#allocation14 + $0x20] sm:$0xff] (!%p2442_p12)  ;;  %v2055_v14 = vld [vmem:[#allocation14 + $0x28] sm:$0xff] (!%p2442_p12) }
 0x711   : > { %2036 = vst [vmem:[%s4517_s14 + $0x30] sm:$0xff] %v2019_v41  ;;  %v2020_v24 = vmax.f32 %v4550_v21, 0.0 }
 0x712   : > { %2034 = vst [vmem:[%s4517_s14 + $0x20] sm:$0xff] %v2017_v50  ;;  %v2018_v15 = vmax.f32 %v4553_v11, 0.0 }
 0x713   : > { %2037 = vst [vmem:[%s4517_s14 + $0x38] sm:$0xff] %v2020_v24 }
 0x714   : > { %2035 = vst [vmem:[%s4517_s14 + $0x28] sm:$0xff] %v2018_v15 }
 0x71a   : > { %v2917_v18 = vpop.f32.mrb[8].mxu1 }
 0x71b   : > { %v1991_v40 = vmul.f32 %v2917_v18, %v4490_v0  ;;  %v1931_v45 = vpop.f32.mrb[9].mxu1  ;;  %v3051_v18 = vpack.c.bf16 (!%p2442_p12), %v2055_v14, %v2054_v30 }
 0x71c   : > { %v1989_v29 = vmul.f32 %v4490_v0, %v1931_v45  ;;  %v2918_v33 = vpop.f32.mrb[10].mxu1  ;;  %v2059_v45 = vld [vmem:[#allocation14 + $0x48] sm:$0xff] (!%p2442_p12) }
 0x71d   : > { %v4575_v20 = vadd.f32 %v1991_v40, %v1974_v27  ;;  %v1992_v43 = vmul.f32 %v2918_v33, %v4490_v0  ;;  %v1934_v37 = vpop.f32.mrb[11].mxu1  ;;  %v2056_v27 = vld [vmem:[#allocation14 + $0x30] sm:$0xff] (!%p2442_p12)  ;;  %v2057_v40 = vld [vmem:[#allocation14 + $0x38] sm:$0xff] (!%p2442_p12) }
 0x71e   : > { %v2005_v49 = vadd.f32 %v1989_v29, %v1972_v55  ;;  %v1990_v59 = vmul.f32 %v4490_v0, %v1934_v37  ;;  %v3055_v10 = vpack.c.bf16 (!%p2442_p12), %v2057_v40, %v2056_v27  ;;  %v3059_v55 = vpack.c.bf16 (!%p2442_p12), %v2059_v45, %v2058_v22  ;;  %v2060_v29 = vld [vmem:[#allocation14 + $0x50] sm:$0xff] (!%p2442_p12)  ;;  %v2061_v33 = vld [vmem:[#allocation14 + $0x58] sm:$0xff] (!%p2442_p12)  ;;  %v2063_v37 = vld [vmem:[#allocation14 + $0x68] sm:$0xff] (!%p2442_p12) }
 0x71f   : > { %v2023_v52 = vmax.f32 %v4575_v20, 0.0  ;;  %v4584_v63 = vadd.f32 %v1992_v43, %v1975_v34  ;;  %v3063_v34 = vpack.c.bf16 (!%p2442_p12), %v2061_v33, %v2060_v29  ;;  %v2062_v43 = vld [vmem:[#allocation14 + $0x60] sm:$0xff] (!%p2442_p12) }
 0x720   : > { %v2021_v1 = vmax.f32 %v2005_v49, 0.0  ;;  %v4586_v2 = vadd.f32 %v1990_v59, %v1973_v51  ;;  %v3067_v49 = vpack.c.bf16 (!%p2442_p12), %v2063_v37, %v2062_v43  ;;  %v2064_v51 = vld [vmem:[#allocation14 + $0x70] sm:$0xff] (!%p2442_p12)  ;;  %v2065_v59 = vld [vmem:[#allocation14 + $0x78] sm:$0xff] (!%p2442_p12) }
 0x721   : > { %2040 = vst [vmem:[%s4517_s14 + $0x50] sm:$0xff] %v2023_v52  ;;  %v2024_v28 = vmax.f32 %v4584_v63, 0.0 }
 0x722   : > { %2038 = vst [vmem:[%s4517_s14 + $0x40] sm:$0xff] %v2021_v1  ;;  %v2022_v3 = vmax.f32 %v4586_v2, 0.0  ;;  %2967 = vmatprep.mubr.f32.mxu1 (!%p2442_p12), %v2021_v1  ;;  %v3071_v1 = vpack.c.bf16 (!%p2442_p12), %v2065_v59, %v2064_v51 }
 0x723   : > { %2041 = vst [vmem:[%s4517_s14 + $0x58] sm:$0xff] %v2024_v28 }
 0x724   : > { %2039 = vst [vmem:[%s4517_s14 + $0x48] sm:$0xff] %v2022_v3 }
 0x72a   : > { %v2921_v60 = vpop.f32.mrb[12].mxu1 }
 0x72b   : > { %v1995_v5 = vmul.f32 %v2921_v60, %v4490_v0  ;;  %v1947_v6 = vpop.f32.mrb[13].mxu1 }
 0x72c   : > { %v1993_v8 = vmul.f32 %v4490_v0, %v1947_v6  ;;  %v2922_v47 = vpop.f32.mrb[14].mxu1 }
 0x72d   : > { %v4606_v13 = vadd.f32 %v1995_v5, %v1978_v4  ;;  %v1996_v36 = vmul.f32 %v2922_v47, %v4490_v0  ;;  %v1950_v17 = vpop.f32.mrb[15].mxu1 }
 0x72e   : > { %v4611_v62 = vadd.f32 %v1993_v8, %v1976_v46  ;;  %v1994_v42 = vmul.f32 %v4490_v0, %v1950_v17  ;;  %2049 = sbr.rel (%p2442_p12) target bundleno = 2101 (0x835), region = 88  ;;  %v2050_v0 = vld [vmem:[#allocation14] sm:$0xff] (!%p2442_p12) }
 0x72f   : > { %v2027_v26 = vmax.f32 %v4606_v13, 0.0  ;;  %v4617_v54 = vadd.f32 %v1996_v36, %v1979_v39  ;;  %v3043_v35 = vpack.c.bf16 (!%p2442_p12), %v2051_v58, %v2050_v0 }
 0x730   : > { %v2025_v57 = vmax.f32 %v4611_v62, 0.0  ;;  %v4620_v31 = vadd.f32 %v1994_v42, %v1977_v25 }
 0x731   : > { %2044 = vst [vmem:[%s4517_s14 + $0x70] sm:$0xff] %v2027_v26  ;;  %v2028_v56 = vmax.f32 %v4617_v54, 0.0  ;;  %3044 = vmatprep.subr.bf16.mxu0 (!%p2442_p12), %v3043_v35  ;;  %3107 = vmatprep.subr.bf16.mxu1 (!%p2442_p12), %v3043_v35 }
 0x732   : > { %2042 = vst [vmem:[%s4517_s14 + $0x60] sm:$0xff] %v2025_v57  ;;  %v2026_v16 = vmax.f32 %v4620_v31, 0.0  ;;  %3046 = vmatpush3.bf16.msra.mxu0 (!%p2442_p12), %v3043_v35  ;;  %3115 = vmatpush3.bf16.msra.mxu1 (!%p2442_p12), %v3043_v35 }
 0x733   : > { %2045 = vst [vmem:[%s4517_s14 + $0x78] sm:$0xff] %v2028_v56  ;;  %3048 = vmatprep.subr.bf16.mxu0 (!%p2442_p12), %v3047_v38  ;;  %3108 = vmatprep.subr.bf16.mxu1 (!%p2442_p12), %v3047_v38 }
 0x734   : > { %2043 = vst [vmem:[%s4517_s14 + $0x68] sm:$0xff] %v2026_v16 }
 0x736   : > { %3050 = vmatpush3.bf16.msra.mxu0 %v3047_v38  ;;  %3116 = vmatpush3.bf16.msra.mxu1 %v3047_v38 }
 0x737   : > { %3052 = vmatprep.subr.bf16.mxu0 %v3051_v18  ;;  %3109 = vmatprep.subr.bf16.mxu1 %v3051_v18 }
 0x73a   : > { %3054 = vmatpush3.bf16.msra.mxu0 %v3051_v18  ;;  %3117 = vmatpush3.bf16.msra.mxu1 %v3051_v18 }
 0x73b   : > { %3056 = vmatprep.subr.bf16.mxu0 %v3055_v10  ;;  %3110 = vmatprep.subr.bf16.mxu1 %v3055_v10 }
 0x73e   : > { %3058 = vmatpush3.bf16.msra.mxu0 %v3055_v10  ;;  %3118 = vmatpush3.bf16.msra.mxu1 %v3055_v10 }
 0x73f   : > { %3060 = vmatprep.subr.bf16.mxu0 %v3059_v55  ;;  %3111 = vmatprep.subr.bf16.mxu1 %v3059_v55 }
 0x742   : > { %3062 = vmatpush3.bf16.msra.mxu0 %v3059_v55  ;;  %3119 = vmatpush3.bf16.msra.mxu1 %v3059_v55 }
 0x743   : > { %3064 = vmatprep.subr.bf16.mxu0 %v3063_v34  ;;  %3112 = vmatprep.subr.bf16.mxu1 %v3063_v34 }
 0x746   : > { %3066 = vmatpush3.bf16.msra.mxu0 %v3063_v34  ;;  %3120 = vmatpush3.bf16.msra.mxu1 %v3063_v34 }
 0x747   : > { %3068 = vmatprep.subr.bf16.mxu0 %v3067_v49  ;;  %3113 = vmatprep.subr.bf16.mxu1 %v3067_v49 }
 0x74a   : > { %3070 = vmatpush3.bf16.msra.mxu0 %v3067_v49  ;;  %3121 = vmatpush3.bf16.msra.mxu1 %v3067_v49 }
 0x74b   : > { %3072 = vmatprep.subr.bf16.mxu0 %v3071_v1  ;;  %3114 = vmatprep.subr.bf16.mxu1 %v3071_v1 }
 0x74e   : > { %3074 = vmatpush3.bf16.msra.mxu0 %v3071_v1  ;;  %3122 = vmatpush3.bf16.msra.mxu1 %v3071_v1 }
 0x751   : > { %2956 = vmatmul.mubr.f32.vlgmr.msra.gmra.mrb[0].mxu0 %v2014_v53  ;;  %2968 = vmatmul.mubr.f32.vlgmr.msra.gmra.mrb[0].mxu1 %v2022_v3 }
 0x752   : > { %2958 = vmatprep.mubr.f32.mxu0 %v2015_v44  ;;  %2970 = vmatprep.mubr.f32.mxu1 %v2023_v52 }
 0x755   : > { %2959 = vmatmul.mubr.f32.gmra.mrb[2].mxu0 %v2016_v48  ;;  %2971 = vmatmul.mubr.f32.gmra.mrb[2].mxu1 %v2024_v28 }
 0x756   : > { %2961 = vmatprep.mubr.f32.mxu0 %v2017_v50  ;;  %2973 = vmatprep.mubr.f32.mxu1 %v2025_v57 }
 0x759   : > { %2962 = vmatmul.mubr.f32.gmra.mrb[4].mxu0 %v2018_v15  ;;  %2974 = vmatmul.mubr.f32.gmra.mrb[4].mxu1 %v2026_v16 }
 0x75a   : > { %2964 = vmatprep.mubr.f32.mxu0 %v2019_v41  ;;  %2976 = vmatprep.mubr.f32.mxu1 %v2027_v26 }
 0x75d   : > { %2965 = vmatmul.mubr.f32.gmra.mrb[6].mxu0 %v2020_v24  ;;  %2977 = vmatmul.mubr.f32.gmra.mrb[6].mxu1 %v2028_v56 }
 0x824   : > { %v2957_v44 = vpop.f32.mrb[0].mxu0  ;;  %v2969_v19 = vpop.f32.mrb[0].mxu1 }
 0x825   : > { %v2145_v61 = vadd.f32 %v2957_v44, %v2443_v7  ;;  %v2185_v48 = vadd.f32 %v2969_v19, %v2443_v7  ;;  %v2139_v53 = vpop.f32.mrb[1].mxu0  ;;  %v2179_v32 = vpop.f32.mrb[1].mxu1 }
 0x826   : > { %v2140_v12 = vadd.f32 %v2443_v7, %v2139_v53  ;;  %v2180_v41 = vadd.f32 %v2443_v7, %v2179_v32 }
 0x827   : > { %2220 = vst [vmem:[%s4671_s11 + $0x8] sm:$0xff] %v2145_v61  ;;  %2228 = vst [vmem:[%s4671_s11 + $0x48] sm:$0xff] %v2185_v48 }
 0x828   : > { %2219 = vst [vmem:[%s4671_s11] sm:$0xff] %v2140_v12  ;;  %2227 = vst [vmem:[%s4671_s11 + $0x40] sm:$0xff] %v2180_v41  ;;  %v2960_v21 = vpop.f32.mrb[2].mxu0  ;;  %v2972_v50 = vpop.f32.mrb[2].mxu1 }
 0x829   : > { %v2155_v11 = vadd.f32 %v2960_v21, %v2443_v7  ;;  %v2195_v24 = vadd.f32 %v2972_v50, %v2443_v7  ;;  %v2149_v15 = vpop.f32.mrb[3].mxu0  ;;  %v2189_v20 = vpop.f32.mrb[3].mxu1 }
 0x82a   : > { %v2150_v52 = vadd.f32 %v2443_v7, %v2149_v15  ;;  %v2190_v63 = vadd.f32 %v2443_v7, %v2189_v20 }
 0x82b   : > { %2222 = vst [vmem:[%s4671_s11 + $0x18] sm:$0xff] %v2155_v11  ;;  %2230 = vst [vmem:[%s4671_s11 + $0x58] sm:$0xff] %v2195_v24 }
 0x82c   : > { %2221 = vst [vmem:[%s4671_s11 + $0x10] sm:$0xff] %v2150_v52  ;;  %2229 = vst [vmem:[%s4671_s11 + $0x50] sm:$0xff] %v2190_v63  ;;  %v2963_v2 = vpop.f32.mrb[4].mxu0  ;;  %v2975_v28 = vpop.f32.mrb[4].mxu1 }
 0x82d   : > { %v2165_v3 = vadd.f32 %v2963_v2, %v2443_v7  ;;  %v2205_v60 = vadd.f32 %v2975_v28, %v2443_v7  ;;  %v2159_v4 = vpop.f32.mrb[5].mxu0  ;;  %v2199_v5 = vpop.f32.mrb[5].mxu1 }
 0x82e   : > { %v2160_v6 = vadd.f32 %v2443_v7, %v2159_v4  ;;  %v2200_v46 = vadd.f32 %v2443_v7, %v2199_v5 }
 0x82f   : > { %2224 = vst [vmem:[%s4671_s11 + $0x28] sm:$0xff] %v2165_v3  ;;  %2232 = vst [vmem:[%s4671_s11 + $0x68] sm:$0xff] %v2205_v60 }
 0x830   : > { %2223 = vst [vmem:[%s4671_s11 + $0x20] sm:$0xff] %v2160_v6  ;;  %2231 = vst [vmem:[%s4671_s11 + $0x60] sm:$0xff] %v2200_v46  ;;  %v2966_v8 = vpop.f32.mrb[6].mxu0  ;;  %v2978_v47 = vpop.f32.mrb[6].mxu1 }
 0x831   : > { %v2175_v13 = vadd.f32 %v2966_v8, %v2443_v7  ;;  %v2215_v39 = vadd.f32 %v2978_v47, %v2443_v7  ;;  %v2169_v36 = vpop.f32.mrb[7].mxu0  ;;  %v2209_v17 = vpop.f32.mrb[7].mxu1 }
 0x832   : > { %v2170_v62 = vadd.f32 %v2443_v7, %v2169_v36  ;;  %v2210_v25 = vadd.f32 %v2443_v7, %v2209_v17 }
 0x833   : > { %2226 = vst [vmem:[%s4671_s11 + $0x38] sm:$0xff] %v2175_v13  ;;  %2234 = vst [vmem:[%s4671_s11 + $0x78] sm:$0xff] %v2215_v39 }
 0x834   : > { %2225 = vst [vmem:[%s4671_s11 + $0x30] sm:$0xff] %v2170_v62  ;;  %2233 = vst [vmem:[%s4671_s11 + $0x70] sm:$0xff] %v2210_v25 }
 0x835 PF: > { %p3167_p4 = scmp.eq.s32.totalorder %s3732_s25, 7  ;;  %s3620_s21 = smov [#allocation15]  }
 0x836   : > { %s2241_s15 = sshll.u32 %s3620_s21, 4  ;;  %s2242_s15 = int_to_ptr.vmem [resolvable:$true] %s2241_s15 }
 0x837   : > { %s3470_s28 = scalar_lea.vmem %s2242_s15, 4096  ;;  %p3477_p5 = scmp.lt.s32.totalorder %s2242_s15, %s2242_s15 }
 0x838   : > { %p3471_p7 = scmp.ne.s32.totalorder %s2242_s15, %s3470_s28  ;;  %p3478_p2 = scmp.lt.s32.totalorder %s3470_s28, %s3470_s28 }
 0x83a   : > { %p3472_p9 = pnand %p3471_p7, %p3167_p4  ;;  %p3479_p1 = por %p3478_p2, %p3477_p5 }
 0x83c   : > { %p3473_p10 = pneg %p3472_p9 }
 0x83e   : > { %p3480_p6 = pnand %p3479_p1, %p3473_p10 }
 0x840   : > { %3483 = shalt.err (!%p3480_p6)
}
 0x841   : > { %s4813_s29 = sld [smem:[#allocation31_spill]] }
 0x847   : > { %s3484_s3 = scalar_lea.hbm %s4813_s29, 4096 }
 0x848   : > { %p3485_p8 = scmp.ne.s32.totalorder %s4813_s29, %s3484_s3  ;;  %p3490_p11 = scmp.lt.u32.totalorder %s3484_s3, %s4813_s29 }
 0x84a   : > { %p3486_p13 = pnand %p3485_p8, %p3167_p4 }
 0x84c   : > { %p3487_p3 = pneg %p3486_p13 }
 0x84e   : > { %p3492_p0 = pnand %p3490_p11, %p3487_p3 }
 0x850   : > { %3495 = shalt.err (!%p3492_p0)
}
 0x851   : > { %s3621_s30 = smov 128   ;;  %s3622_s14 = smov 8  }
 0x852   : > { %3140 = dma.vmem_to_hbm [thread:$0]  (%p3167_p4), %s2242_s15, 4096, %s4813_s29, [#allocation9], %s3621_s30, %s3621_s30, %s3622_s14  }
 0x853   : > { %3563 = dma.done.wait (%p3167_p4), [#allocation9], 4096  }
 0x854   : > { %3565 = vsyncadd (%p3167_p4), [#allocation9], 4294963200 }
 0x855 PF: > { %s25_s24 = sadd.s32 1, %s3608_s24   ;;  %s4814_s13 = sld [smem:[#allocation25_spill]] }
 0x856   : > { %p22_p12 = scmp.ge.s32.totalorder %s25_s24, 10   ;;  %s4815_s15 = smov %s3572_s16 }
 0x857   : > { %s4816_s16 = smov %s3576_s17  ;;  %s4817_s17 = smov %s3932_s2 }
 0x858   : > { %s4818_s18 = smov %s3584_s19  ;;  %s4819_s19 = smov %s3588_s20 }
 0x859   : > { %s4820_s20 = smov %s3833_s7  ;;  %s4821_s21 = smov %s3600_s22 }
 0x85a   : > { %s4822_s0 = smov %s3604_s23  ;;  %s4824_s23 = smov %s4830_s9 }
 0x85b   : > { %s4823_s22 = smov %s4814_s13  ;;  %24 = sbr.rel (!%p22_p12) target bundleno = 21 (0x15), region = 133 }
 0x862   :  { %2257 = vsyncpa [#allocation8], 1 }
 0x863   :  { %2259 = vsyncpa [#allocation8 + $0x1], 1 }
 0x864   :  { %2260 = vsyncpa [#allocation11], 1 }
 0x865   :  { %2261 = vsyncpa [#allocation9], 1 }
 0x866   :  { %2263 = vsyncpa [#allocation9 + $0x1], 1 }

</bundles_post_ra>
